<compile_context>
chip_gen: v7x
topology: tpu7x:2x2x1
jax: 0.10.0
libtpu: 0.0.40
codegen_flags: <defaults>
</compile_context>

<pallas_src>
import jax
import jax.numpy as jnp
import numpy as np
from jax.experimental import pallas as pl
from jax.experimental.pallas import tpu as pltpu

EPS = 1e-5


# ----------------------------- host-side constants ---------------------------

def _tap_table(H, W, L):
    """(tap index, lane-roll amount, needs_mask) for a 3x3 / pad=1 stencil on a
    row-major (h, w) lane axis of length L (possibly several images back to
    back; the border masks make cross-image wraparound harmless)."""
    taps = []
    for kh in range(3):
        for kw in range(3):
            dh, dw = kh - 1, kw - 1
            d = dh * W + dw                       # want result[p] = src[p + d]
            taps.append((kh * 3 + kw, (-d) % L, (dh, dw) != (0, 0)))
    return taps


def _tap_masks(H, W, reps):
    """(9, reps*HW) 0/1 masks: mask[t, p] == 1 iff tap t of pixel p stays inside
    its own image (zero padding elsewhere)."""
    HW = H * W
    hh, ww = np.divmod(np.arange(HW), W)
    m = np.empty((9, HW), np.float32)
    for kh in range(3):
        for kw in range(3):
            dh, dw = kh - 1, kw - 1
            ok = ((hh + dh >= 0) & (hh + dh < H) &
                  (ww + dw >= 0) & (ww + dw < W))
            m[kh * 3 + kw] = ok.astype(np.float32)
    return np.tile(m, (1, reps))


def _subsample_matrix(H, W):
    """S: (HW, Ho*Wo) selecting the stride-2 (k=3, p=1) conv centers."""
    Ho, Wo = H // 2, W // 2
    S = np.zeros((H * W, Ho * Wo), np.float32)
    for oh in range(Ho):
        for ow in range(Wo):
            S[(2 * oh) * W + 2 * ow, oh * Wo + ow] = 1.0
    return S


def _avgpool_matrix(H, W):
    """P: (HW, Ho*Wo) implementing AvgPool2d(3, stride=2, padding=1),
    count_include_pad=True, as one matmul."""
    Ho, Wo = H // 2, W // 2
    P = np.zeros((H * W, Ho * Wo), np.float32)
    for oh in range(Ho):
        for ow in range(Wo):
            for kh in range(3):
                for kw in range(3):
                    ih, iw = 2 * oh - 1 + kh, 2 * ow - 1 + kw
                    if 0 <= ih < H and 0 <= iw < W:
                        P[ih * W + iw, oh * Wo + ow] = 1.0 / 9.0
    return P


def _batch_block_diag(M, nb):
    return np.kron(np.eye(nb, dtype=np.float32), np.asarray(M, np.float32))


def _pick_nb(N, Lo):
    """Images per grid step: lane-dense output block (multiple of 128 lanes)
    first, then amortize per-step overhead while keeping several grid steps."""
    def ok(nb):
        return (nb * Lo) % 128 == 0 or nb == N
    nb = 1
    while nb < N and not ok(nb):
        nb += 1
        while N % nb:
            nb += 1
    if N % (2 * nb) == 0 and N // (2 * nb) >= 4 and ok(2 * nb):
        nb *= 2
    return nb


# ------------------------- fused ShuffleNetUnit kernel ------------------------

def _make_unit_kernel(*, taps, nb, in_ch, cat_path):
    def kernel(x_ref, w1_ref, b1_ref, wd_ref, w2_ref, b2_ref, m_ref, *rest):
        if cat_path:
            sel_ref, pool_ref, o_ref = rest
        else:
            (o_ref,) = rest

        # (Nb, C, HW) -> (C, Nb*HW): per-image slabs side by side on the lane
        # axis (256-lane aligned pieces -> tile-aligned copies, no relayout).
        if nb == 1:
            x = x_ref[0].astype(jnp.float32)
        else:
            x = jnp.concatenate([x_ref[b].astype(jnp.float32)
                                 for b in range(nb)], axis=1)

        # bottleneck grouped 1x1 conv (BN scale folded) + shift + ReLU
        y1 = jnp.dot(w1_ref[...], x, preferred_element_type=jnp.float32)
        y1 = jnp.maximum(y1 + b1_ref[...], 0.0)                  # (mid, L)

        # depthwise 3x3 (channel shuffle + BN scale folded into the weights):
        # 9 XLU lane rolls with precomputed border masks.
        wd = wd_ref[...]                                         # (mid, 9)
        masks = m_ref[...]                                       # (9, L)
        dwo = None
        for t, amt, needs_mask in taps:
            sh = pltpu.roll(y1, shift=amt, axis=1) if amt else y1
            if needs_mask:
                sh = sh * masks[t:t + 1]
            contrib = wd[:, t:t + 1] * sh
            dwo = contrib if dwo is None else dwo + contrib      # (mid, L)

        if cat_path:
            # stride-2 subsample = constant selection matmul (MXU ~idle here)
            dwo = jnp.dot(dwo, sel_ref[...],
                          preferred_element_type=jnp.float32)    # (mid, Lob)

        # expand grouped 1x1 conv (BN scale + depthwise BN shift pre-folded)
        y2 = jnp.dot(w2_ref[...], dwo, preferred_element_type=jnp.float32)
        y2 = y2 + b2_ref[...]                                    # (cexp, Lob)

        if cat_path:
            # AvgPool2d(3, s=2, p=1) shortcut folded into one constant matmul
            pool = jnp.dot(x, pool_ref[...],
                           preferred_element_type=jnp.float32)   # (C, Lob)
            o_ref[:in_ch, :] = jnp.maximum(pool, 0.0).astype(o_ref.dtype)
            o_ref[in_ch:, :] = jnp.maximum(y2, 0.0).astype(o_ref.dtype)
        else:
            o_ref[...] = jnp.maximum(x + y2, 0.0).astype(o_ref.dtype)

    return kernel


# --------------------- one-time host-side parameter prep ----------------------

def _block_diag(w, groups):
    w = np.asarray(w, np.float32)
    cout, cin_g = w.shape
    cout_g = cout // groups
    wd = np.zeros((cout, cin_g * groups), np.float32)
    for g in range(groups):
        wd[g * cout_g:(g + 1) * cout_g,
           g * cin_g:(g + 1) * cin_g] = w[g * cout_g:(g + 1) * cout_g]
    return wd


def _fold_bn(bias, bn):
    scale = np.asarray(bn['gamma']) / np.sqrt(np.asarray(bn['var']) + EPS)
    shift = np.asarray(bn['beta']) + scale * (np.asarray(bias) - np.asarray(bn['mean']))
    return scale.astype(np.float32), shift.astype(np.float32)


def prepare_params(p, *, groups, in_ch, out_ch, cat_path):
    """Fold BN into weights, channel shuffle into parameter ordering, and the
    depthwise BN shift through the (linear) expand conv."""
    mid = out_ch // 4
    cexp = out_ch - in_ch if cat_path else out_ch

    s1, t1 = _fold_bn(p['b1'], p['bn1'])
    sd, td = _fold_bn(p['bd'], p['bnd'])
    s2, t2 = _fold_bn(p['b2'], p['bn2'])

    cpg = mid // groups
    perm = np.arange(mid).reshape(groups, cpg).T.reshape(-1)   # shuffled[c]=y1[perm[c]]
    perm_inv = np.argsort(perm)

    w1s = s1[:, None] * _block_diag(p['w1'], groups)                       # (mid, Cin)
    wds = (sd[:, None] * np.asarray(p['wd'], np.float32).reshape(mid, 9))[perm_inv]
    bd = td[perm_inv]
    w2s = (s2[:, None] * _block_diag(p['w2'], groups))[:, perm_inv]        # (Cexp, mid)
    b2 = w2s @ bd + t2               # depthwise BN shift folded through expand

    assert w2s.shape[0] == cexp
    return dict(
        w1s=jnp.asarray(w1s), b1=jnp.asarray(t1.reshape(mid, 1)),
        wds=jnp.asarray(wds),
        w2s=jnp.asarray(w2s), b2=jnp.asarray(b2.reshape(cexp, 1)),
    )


# ----------------------------------- forward ----------------------------------

def shufflenet_unit_forward(x, prep, *, stride, groups, in_ch, out_ch):
    del groups  # grouping already folded into the prepared weights
    cat_path = (stride != 1) or (in_ch != out_ch)
    N, C, H, W = x.shape
    assert C == in_ch
    HW = H * W
    mid = prep['w1s'].shape[0]
    cexp = prep['w2s'].shape[0]

    if cat_path:
        # NOTE: the PyTorch module's shortcut is always AvgPool2d(stride=2); a
        # stride=1 cat unit would hit a shape mismatch at torch.cat as well.
        assert stride == 2 and H % 2 == 0 and W % 2 == 0
        Ho, Wo = H // 2, W // 2
        out_c = in_ch + cexp
    else:
        assert stride == 1 and cexp == in_ch
        Ho, Wo = H, W
        out_c = cexp
    Lo = Ho * Wo
    assert out_c == out_ch

    nb = _pick_nb(N, Lo)
    assert N % nb == 0
    nblk = N // nb
    L = nb * HW          # lane length of the batched input slab
    Lob = nb * Lo        # lane length of the batched output slab

    x3 = x.reshape(N, C, HW)
    taps = _tap_table(H, W, L)
    masks = jnp.asarray(_tap_masks(H, W, nb))

    kernel = _make_unit_kernel(taps=taps, nb=nb, in_ch=in_ch, cat_path=cat_path)

    args = [x3, prep['w1s'], prep['b1'], prep['wds'], prep['w2s'], prep['b2'],
            masks]
    in_specs = [
        pl.BlockSpec((nb, C, HW), lambda i: (i, 0, 0)),
        pl.BlockSpec((mid, C), lambda i: (0, 0)),
        pl.BlockSpec((mid, 1), lambda i: (0, 0)),
        pl.BlockSpec((mid, 9), lambda i: (0, 0)),
        pl.BlockSpec((cexp, mid), lambda i: (0, 0)),
        pl.BlockSpec((cexp, 1), lambda i: (0, 0)),
        pl.BlockSpec((9, L), lambda i: (0, 0)),
    ]
    if cat_path:
        sel = jnp.asarray(_batch_block_diag(_subsample_matrix(H, W), nb))
        poolm = jnp.asarray(_batch_block_diag(_avgpool_matrix(H, W), nb))
        args += [sel, poolm]
        in_specs += [pl.BlockSpec((L, Lob), lambda i: (0, 0)),
                     pl.BlockSpec((L, Lob), lambda i: (0, 0))]

    # Advisory cost hint for the XLA scheduler.
    mm_flops = 2 * mid * C * L + 2 * cexp * mid * Lob
    if cat_path:
        mm_flops += 2 * mid * L * Lob + 2 * C * L * Lob
    dw_flops = 9 * 3 * mid * L
    flops = int(nblk * (mm_flops + dw_flops))
    bytes_accessed = int(4 * (N * C * HW + out_c * N * Lo +
                              sum(int(np.prod(a.shape)) for a in args[1:])))

    out2 = pl.pallas_call(
        kernel,
        out_shape=jax.ShapeDtypeStruct((out_c, N * Lo), x.dtype),
        grid=(nblk,),
        in_specs=in_specs,
        out_specs=pl.BlockSpec((out_c, Lob), lambda i: (0, i)),
        compiler_params=pltpu.CompilerParams(dimension_semantics=("parallel",)),
        cost_estimate=pl.CostEstimate(flops=flops, transcendentals=0,
                                      bytes_accessed=bytes_accessed),
    )(*args)

    # Lane-dense (C_out, N*Lo) slab -> NCHW (wrapper-side layout plumbing).
    return out2.reshape(out_c, N, Ho, Wo).transpose(1, 0, 2, 3)


# ----------------------------- raw parameter init -----------------------------

def init_params(key, in_ch, out_ch, groups, cat_path):
    mid = out_ch // 4
    cexp = out_ch - in_ch if cat_path else out_ch
    ks = jax.random.split(key, 9)

    def bn(k, c):
        k1, k2, k3, k4 = jax.random.split(k, 4)
        return dict(gamma=jax.random.uniform(k1, (c,), minval=0.5, maxval=1.5),
                    beta=jax.random.normal(k2, (c,)) * 0.1,
                    mean=jax.random.normal(k3, (c,)) * 0.1,
                    var=jax.random.uniform(k4, (c,), minval=0.5, maxval=1.5))

    return dict(
        w1=jax.random.normal(ks[0], (mid, in_ch // groups)) * 0.2,
        b1=jax.random.normal(ks[1], (mid,)) * 0.1,
        bn1=bn(ks[2], mid),
        wd=jax.random.normal(ks[3], (mid, 3, 3)) * 0.2,
        bd=jax.random.normal(ks[4], (mid,)) * 0.1,
        bnd=bn(ks[5], mid),
        w2=jax.random.normal(ks[6], (cexp, mid // groups)) * 0.2,
        b2=jax.random.normal(ks[7], (cexp,)) * 0.1,
        bn2=bn(ks[8], cexp),
    )


# ------------------------------ pure-JAX reference -----------------------------

def channel_shuffle(x, groups):
    N, C, H, W = x.shape
    cpg = C // groups
    return (x.reshape(N, groups, cpg, H, W)
             .transpose(0, 2, 1, 3, 4)
             .reshape(N, C, H, W))


def ref_forward(x, p, *, stride, groups, in_ch, out_ch):
    cat_path = (stride != 1) or (in_ch != out_ch)
    mid = out_ch // 4

    def bn(y, prm):
        g = prm['gamma'][None, :, None, None]
        b = prm['beta'][None, :, None, None]
        m = prm['mean'][None, :, None, None]
        v = prm['var'][None, :, None, None]
        return g * (y - m) / jnp.sqrt(v + EPS) + b

    def conv(xx, w, b, stride=1, padding=0, fgc=1):
        y = jax.lax.conv_general_dilated(
            xx, w, (stride, stride), [(padding, padding)] * 2,
            feature_group_count=fgc,
            dimension_numbers=('NCHW', 'OIHW', 'NCHW'))
        return y + b[None, :, None, None]

    if cat_path:
        s = jax.lax.reduce_window(x, 0.0, jax.lax.add, (1, 1, 3, 3),
                                  (1, 1, 2, 2),
                                  [(0, 0), (0, 0), (1, 1), (1, 1)]) / 9.0
    else:
        s = x

    y = jax.nn.relu(bn(conv(x, p['w1'][:, :, None, None], p['b1'], fgc=groups),
                       p['bn1']))
    y = channel_shuffle(y, groups)
    y = bn(conv(y, p['wd'][:, None, :, :], p['bd'], stride=stride, padding=1,
                fgc=mid), p['bnd'])
    y = bn(conv(y, p['w2'][:, :, None, None], p['b2'], fgc=groups), p['bn2'])

    if cat_path:
        return jax.nn.relu(jnp.concatenate([s, y], axis=1))
    return jax.nn.relu(s + y)


# ------------------------------------- main ------------------------------------

if __name__ == "__main__":
    key = jax.random.PRNGKey(0)
    kx1, kp1, kx2, kp2 = jax.random.split(key, 4)

    # Config A: stage-entry unit -> stride=2, in!=out, avgpool shortcut + concat
    N, Ci, Co, G, S, H, W = 8, 8, 32, 2, 2, 16, 16
    x = jax.random.normal(kx1, (N, Ci, H, W), jnp.float32)
    p = init_params(kp1, Ci, Co, G, cat_path=True)
    prep = prepare_params(p, groups=G, in_ch=Ci, out_ch=Co, cat_path=True)
    out = shufflenet_unit_forward(x, prep, stride=S, groups=G, in_ch=Ci, out_ch=Co)
    out = jax.block_until_ready(out)
    assert out.shape == (N, Co, H // 2, W // 2), out.shape
    ref = ref_forward(x, p, stride=S, groups=G, in_ch=Ci, out_ch=Co)
    np.testing.assert_allclose(np.asarray(out), np.asarray(ref),
                               rtol=1e-4, atol=2e-4)

    # Config B: in-stage unit -> stride=1, in==out, identity shortcut + add
    N, Ci, Co, G, S, H, W = 8, 16, 16, 2, 1, 16, 16
    x2 = jax.random.normal(kx2, (N, Ci, H, W), jnp.float32)
    p2 = init_params(kp2, Ci, Co, G, cat_path=False)
    prep2 = prepare_params(p2, groups=G, in_ch=Ci, out_ch=Co, cat_path=False)
    out2 = shufflenet_unit_forward(x2, prep2, stride=S, groups=G, in_ch=Ci, out_ch=Co)
    out2 = jax.block_until_ready(out2)
    assert out2.shape == (N, Co, H, W), out2.shape
    ref2 = ref_forward(x2, p2, stride=S, groups=G, in_ch=Ci, out_ch=Co)
    np.testing.assert_allclose(np.asarray(out2), np.asarray(ref2),
                               rtol=1e-4, atol=2e-4)

    print("KERNEL_OK")
</pallas_src>

<mosaic_0001>
module attributes {stable_mosaic.version = 11 : i64} {
  func.func @kernel(%arg0: i32, %arg1: memref<2x8x256xf32, #tpu.memory_space<vmem>>, %arg2: memref<8x8xf32, #tpu.memory_space<vmem>>, %arg3: memref<8x1xf32, #tpu.memory_space<vmem>>, %arg4: memref<8x9xf32, #tpu.memory_space<vmem>>, %arg5: memref<24x8xf32, #tpu.memory_space<vmem>>, %arg6: memref<24x1xf32, #tpu.memory_space<vmem>>, %arg7: memref<9x512xf32, #tpu.memory_space<vmem>>, %arg8: memref<512x128xf32, #tpu.memory_space<vmem>>, %arg9: memref<512x128xf32, #tpu.memory_space<vmem>>, %arg10: memref<32x128xf32, #tpu.memory_space<vmem>>) attributes {dimension_semantics = [#tpu.dimension_semantics<parallel>], iteration_bounds = array<i64: 4>, scalar_prefetch = 0 : i64, scratch_operands = 0 : i64, tpu.core_type = #tpu.core_type<tc>, window_params = [{transform_indices = @transform_0, window_bounds = array<i64: 2, 8, 256>}, {pipeline_mode = #tpu.pipeline_mode<synchronous>, transform_indices = @transform_1, window_bounds = array<i64: 8, 8>}, {pipeline_mode = #tpu.pipeline_mode<synchronous>, transform_indices = @transform_2, window_bounds = array<i64: 8, 1>}, {pipeline_mode = #tpu.pipeline_mode<synchronous>, transform_indices = @transform_3, window_bounds = array<i64: 8, 9>}, {pipeline_mode = #tpu.pipeline_mode<synchronous>, transform_indices = @transform_4, window_bounds = array<i64: 24, 8>}, {pipeline_mode = #tpu.pipeline_mode<synchronous>, transform_indices = @transform_5, window_bounds = array<i64: 24, 1>}, {pipeline_mode = #tpu.pipeline_mode<synchronous>, transform_indices = @transform_6, window_bounds = array<i64: 9, 512>}, {pipeline_mode = #tpu.pipeline_mode<synchronous>, transform_indices = @transform_7, window_bounds = array<i64: 512, 128>}, {pipeline_mode = #tpu.pipeline_mode<synchronous>, transform_indices = @transform_8, window_bounds = array<i64: 512, 128>}, {transform_indices = @transform_9, window_bounds = array<i64: 32, 128>}]} {
    %c0 = arith.constant 0 : index
    %c0_0 = arith.constant 0 : index
    %c0_1 = arith.constant 0 : index
    %0 = vector.load %arg1[%c0, %c0_0, %c0_1] : memref<2x8x256xf32, #tpu.memory_space<vmem>>, vector<1x8x256xf32>
    %1 = vector.shape_cast %0 : vector<1x8x256xf32> to vector<8x256xf32>
    %c1 = arith.constant 1 : index
    %c0_2 = arith.constant 0 : index
    %c0_3 = arith.constant 0 : index
    %2 = vector.load %arg1[%c1, %c0_2, %c0_3] : memref<2x8x256xf32, #tpu.memory_space<vmem>>, vector<1x8x256xf32>
    %3 = vector.shape_cast %2 : vector<1x8x256xf32> to vector<8x256xf32>
    %4 = tpu.concatenate %1, %3 in 1 : vector<8x256xf32>, vector<8x256xf32> -> vector<8x512xf32>
    %c0_4 = arith.constant 0 : index
    %c0_5 = arith.constant 0 : index
    %5 = vector.load %arg2[%c0_4, %c0_5] : memref<8x8xf32, #tpu.memory_space<vmem>>, vector<8x8xf32>
    %cst = arith.constant dense<0.000000e+00> : vector<8x512xf32>
    %6 = tpu.matmul %5, %4, %cst {dimension_numbers = #tpu.dot_dimension_numbers<[1], [0], [0], [1], [0, 0, 1, 1], [], []>} : vector<8x8xf32>, vector<8x512xf32>, vector<8x512xf32> -> vector<8x512xf32>
    %c0_6 = arith.constant 0 : index
    %c0_7 = arith.constant 0 : index
    %7 = vector.load %arg3[%c0_6, %c0_7] : memref<8x1xf32, #tpu.memory_space<vmem>>, vector<8x1xf32>
    %8 = vector.broadcast %7 : vector<8x1xf32> to vector<8x512xf32>
    %9 = arith.addf %6, %8 : vector<8x512xf32>
    %cst_8 = arith.constant 0.000000e+00 : f32
    %10 = vector.broadcast %cst_8 : f32 to vector<8x512xf32>
    %11 = arith.maximumf %9, %10 : vector<8x512xf32>
    %c0_9 = arith.constant 0 : index
    %c0_10 = arith.constant 0 : index
    %12 = vector.load %arg4[%c0_9, %c0_10] : memref<8x9xf32, #tpu.memory_space<vmem>>, vector<8x9xf32>
    %c0_11 = arith.constant 0 : index
    %c0_12 = arith.constant 0 : index
    %13 = vector.load %arg7[%c0_11, %c0_12] : memref<9x512xf32, #tpu.memory_space<vmem>>, vector<9x512xf32>
    %c17_i32 = arith.constant 17 : i32
    %14 = tpu.dynamic_rotate %11 by %c17_i32 dim 1 : vector<8x512xf32>, i32 -> vector<8x512xf32>
    %15 = vector.extract_strided_slice %13 {offsets = [0, 0], sizes = [1, 512], strides = [1, 1]} : vector<9x512xf32> to vector<1x512xf32>
    %16 = vector.broadcast %15 : vector<1x512xf32> to vector<8x512xf32>
    %17 = arith.mulf %14, %16 : vector<8x512xf32>
    %18 = vector.extract_strided_slice %12 {offsets = [0, 0], sizes = [8, 1], strides = [1, 1]} : vector<8x9xf32> to vector<8x1xf32>
    %19 = vector.broadcast %18 : vector<8x1xf32> to vector<8x512xf32>
    %20 = arith.mulf %19, %17 : vector<8x512xf32>
    %c16_i32 = arith.constant 16 : i32
    %21 = tpu.dynamic_rotate %11 by %c16_i32 dim 1 : vector<8x512xf32>, i32 -> vector<8x512xf32>
    %22 = vector.extract_strided_slice %13 {offsets = [1, 0], sizes = [1, 512], strides = [1, 1]} : vector<9x512xf32> to vector<1x512xf32>
    %23 = vector.broadcast %22 : vector<1x512xf32> to vector<8x512xf32>
    %24 = arith.mulf %21, %23 : vector<8x512xf32>
    %25 = vector.extract_strided_slice %12 {offsets = [0, 1], sizes = [8, 1], strides = [1, 1]} : vector<8x9xf32> to vector<8x1xf32>
    %26 = vector.broadcast %25 : vector<8x1xf32> to vector<8x512xf32>
    %27 = arith.mulf %26, %24 : vector<8x512xf32>
    %28 = arith.addf %20, %27 : vector<8x512xf32>
    %c15_i32 = arith.constant 15 : i32
    %29 = tpu.dynamic_rotate %11 by %c15_i32 dim 1 : vector<8x512xf32>, i32 -> vector<8x512xf32>
    %30 = vector.extract_strided_slice %13 {offsets = [2, 0], sizes = [1, 512], strides = [1, 1]} : vector<9x512xf32> to vector<1x512xf32>
    %31 = vector.broadcast %30 : vector<1x512xf32> to vector<8x512xf32>
    %32 = arith.mulf %29, %31 : vector<8x512xf32>
    %33 = vector.extract_strided_slice %12 {offsets = [0, 2], sizes = [8, 1], strides = [1, 1]} : vector<8x9xf32> to vector<8x1xf32>
    %34 = vector.broadcast %33 : vector<8x1xf32> to vector<8x512xf32>
    %35 = arith.mulf %34, %32 : vector<8x512xf32>
    %36 = arith.addf %28, %35 : vector<8x512xf32>
    %c1_i32 = arith.constant 1 : i32
    %37 = tpu.dynamic_rotate %11 by %c1_i32 dim 1 : vector<8x512xf32>, i32 -> vector<8x512xf32>
    %38 = vector.extract_strided_slice %13 {offsets = [3, 0], sizes = [1, 512], strides = [1, 1]} : vector<9x512xf32> to vector<1x512xf32>
    %39 = vector.broadcast %38 : vector<1x512xf32> to vector<8x512xf32>
    %40 = arith.mulf %37, %39 : vector<8x512xf32>
    %41 = vector.extract_strided_slice %12 {offsets = [0, 3], sizes = [8, 1], strides = [1, 1]} : vector<8x9xf32> to vector<8x1xf32>
    %42 = vector.broadcast %41 : vector<8x1xf32> to vector<8x512xf32>
    %43 = arith.mulf %42, %40 : vector<8x512xf32>
    %44 = arith.addf %36, %43 : vector<8x512xf32>
    %45 = vector.extract_strided_slice %12 {offsets = [0, 4], sizes = [8, 1], strides = [1, 1]} : vector<8x9xf32> to vector<8x1xf32>
    %46 = vector.broadcast %45 : vector<8x1xf32> to vector<8x512xf32>
    %47 = arith.mulf %46, %11 : vector<8x512xf32>
    %48 = arith.addf %44, %47 : vector<8x512xf32>
    %c511_i32 = arith.constant 511 : i32
    %49 = tpu.dynamic_rotate %11 by %c511_i32 dim 1 : vector<8x512xf32>, i32 -> vector<8x512xf32>
    %50 = vector.extract_strided_slice %13 {offsets = [5, 0], sizes = [1, 512], strides = [1, 1]} : vector<9x512xf32> to vector<1x512xf32>
    %51 = vector.broadcast %50 : vector<1x512xf32> to vector<8x512xf32>
    %52 = arith.mulf %49, %51 : vector<8x512xf32>
    %53 = vector.extract_strided_slice %12 {offsets = [0, 5], sizes = [8, 1], strides = [1, 1]} : vector<8x9xf32> to vector<8x1xf32>
    %54 = vector.broadcast %53 : vector<8x1xf32> to vector<8x512xf32>
    %55 = arith.mulf %54, %52 : vector<8x512xf32>
    %56 = arith.addf %48, %55 : vector<8x512xf32>
    %c497_i32 = arith.constant 497 : i32
    %57 = tpu.dynamic_rotate %11 by %c497_i32 dim 1 : vector<8x512xf32>, i32 -> vector<8x512xf32>
    %58 = vector.extract_strided_slice %13 {offsets = [6, 0], sizes = [1, 512], strides = [1, 1]} : vector<9x512xf32> to vector<1x512xf32>
    %59 = vector.broadcast %58 : vector<1x512xf32> to vector<8x512xf32>
    %60 = arith.mulf %57, %59 : vector<8x512xf32>
    %61 = vector.extract_strided_slice %12 {offsets = [0, 6], sizes = [8, 1], strides = [1, 1]} : vector<8x9xf32> to vector<8x1xf32>
    %62 = vector.broadcast %61 : vector<8x1xf32> to vector<8x512xf32>
    %63 = arith.mulf %62, %60 : vector<8x512xf32>
    %64 = arith.addf %56, %63 : vector<8x512xf32>
    %c496_i32 = arith.constant 496 : i32
    %65 = tpu.dynamic_rotate %11 by %c496_i32 dim 1 : vector<8x512xf32>, i32 -> vector<8x512xf32>
    %66 = vector.extract_strided_slice %13 {offsets = [7, 0], sizes = [1, 512], strides = [1, 1]} : vector<9x512xf32> to vector<1x512xf32>
    %67 = vector.broadcast %66 : vector<1x512xf32> to vector<8x512xf32>
    %68 = arith.mulf %65, %67 : vector<8x512xf32>
    %69 = vector.extract_strided_slice %12 {offsets = [0, 7], sizes = [8, 1], strides = [1, 1]} : vector<8x9xf32> to vector<8x1xf32>
    %70 = vector.broadcast %69 : vector<8x1xf32> to vector<8x512xf32>
    %71 = arith.mulf %70, %68 : vector<8x512xf32>
    %72 = arith.addf %64, %71 : vector<8x512xf32>
    %c495_i32 = arith.constant 495 : i32
    %73 = tpu.dynamic_rotate %11 by %c495_i32 dim 1 : vector<8x512xf32>, i32 -> vector<8x512xf32>
    %74 = vector.extract_strided_slice %13 {offsets = [8, 0], sizes = [1, 512], strides = [1, 1]} : vector<9x512xf32> to vector<1x512xf32>
    %75 = vector.broadcast %74 : vector<1x512xf32> to vector<8x512xf32>
    %76 = arith.mulf %73, %75 : vector<8x512xf32>
    %77 = vector.extract_strided_slice %12 {offsets = [0, 8], sizes = [8, 1], strides = [1, 1]} : vector<8x9xf32> to vector<8x1xf32>
    %78 = vector.broadcast %77 : vector<8x1xf32> to vector<8x512xf32>
    %79 = arith.mulf %78, %76 : vector<8x512xf32>
    %80 = arith.addf %72, %79 : vector<8x512xf32>
    %c0_13 = arith.constant 0 : index
    %c0_14 = arith.constant 0 : index
    %81 = vector.load %arg8[%c0_13, %c0_14] : memref<512x128xf32, #tpu.memory_space<vmem>>, vector<512x128xf32>
    %cst_15 = arith.constant dense<0.000000e+00> : vector<8x128xf32>
    %82 = tpu.matmul %80, %81, %cst_15 {dimension_numbers = #tpu.dot_dimension_numbers<[1], [0], [0], [1], [0, 0, 1, 1], [], []>} : vector<8x512xf32>, vector<512x128xf32>, vector<8x128xf32> -> vector<8x128xf32>
    %c0_16 = arith.constant 0 : index
    %c0_17 = arith.constant 0 : index
    %83 = vector.load %arg5[%c0_16, %c0_17] : memref<24x8xf32, #tpu.memory_space<vmem>>, vector<24x8xf32>
    %cst_18 = arith.constant dense<0.000000e+00> : vector<24x128xf32>
    %84 = tpu.matmul %83, %82, %cst_18 {dimension_numbers = #tpu.dot_dimension_numbers<[1], [0], [0], [1], [0, 0, 1, 1], [], []>} : vector<24x8xf32>, vector<8x128xf32>, vector<24x128xf32> -> vector<24x128xf32>
    %c0_19 = arith.constant 0 : index
    %c0_20 = arith.constant 0 : index
    %85 = vector.load %arg6[%c0_19, %c0_20] : memref<24x1xf32, #tpu.memory_space<vmem>>, vector<24x1xf32>
    %86 = vector.broadcast %85 : vector<24x1xf32> to vector<24x128xf32>
    %87 = arith.addf %84, %86 : vector<24x128xf32>
    %c0_21 = arith.constant 0 : index
    %c0_22 = arith.constant 0 : index
    %88 = vector.load %arg9[%c0_21, %c0_22] : memref<512x128xf32, #tpu.memory_space<vmem>>, vector<512x128xf32>
    %cst_23 = arith.constant dense<0.000000e+00> : vector<8x128xf32>
    %89 = tpu.matmul %4, %88, %cst_23 {dimension_numbers = #tpu.dot_dimension_numbers<[1], [0], [0], [1], [0, 0, 1, 1], [], []>} : vector<8x512xf32>, vector<512x128xf32>, vector<8x128xf32> -> vector<8x128xf32>
    %cst_24 = arith.constant 0.000000e+00 : f32
    %90 = vector.broadcast %cst_24 : f32 to vector<8x128xf32>
    %91 = arith.maximumf %89, %90 : vector<8x128xf32>
    %c0_25 = arith.constant 0 : index
    %c0_26 = arith.constant 0 : index
    %92 = vector.load %arg10[%c0_25, %c0_26] : memref<32x128xf32, #tpu.memory_space<vmem>>, vector<8x128xf32>
    tpu.vector_store %arg10[%c0_25, %c0_26], %91 {strides = array<i32>} : memref<32x128xf32, #tpu.memory_space<vmem>>, vector<8x128xf32>,
    %cst_27 = arith.constant 0.000000e+00 : f32
    %93 = vector.broadcast %cst_27 : f32 to vector<24x128xf32>
    %94 = arith.maximumf %87, %93 : vector<24x128xf32>
    %c8 = arith.constant 8 : index
    %c0_28 = arith.constant 0 : index
    %95 = vector.load %arg10[%c8, %c0_28] : memref<32x128xf32, #tpu.memory_space<vmem>>, vector<24x128xf32>
    tpu.vector_store %arg10[%c8, %c0_28], %94 {strides = array<i32>} : memref<32x128xf32, #tpu.memory_space<vmem>>, vector<24x128xf32>,
    return
  }
  func.func @transform_0(%arg0: i32) -> (i32, i32, i32) {
    %c0_i32 = arith.constant 0 : i32
    %c0_i32_0 = arith.constant 0 : i32
    %c0_i32_1 = arith.constant 0 : i32
    return %arg0, %c0_i32, %c0_i32_0 : i32, i32, i32
  }
  func.func @transform_1(%arg0: i32) -> (i32, i32) {
    %c0_i32 = arith.constant 0 : i32
    %c0_i32_0 = arith.constant 0 : i32
    %c0_i32_1 = arith.constant 0 : i32
    return %c0_i32, %c0_i32_0 : i32, i32
  }
  func.func @transform_2(%arg0: i32) -> (i32, i32) {
    %c0_i32 = arith.constant 0 : i32
    %c0_i32_0 = arith.constant 0 : i32
    %c0_i32_1 = arith.constant 0 : i32
    return %c0_i32, %c0_i32_0 : i32, i32
  }
  func.func @transform_3(%arg0: i32) -> (i32, i32) {
    %c0_i32 = arith.constant 0 : i32
    %c0_i32_0 = arith.constant 0 : i32
    %c0_i32_1 = arith.constant 0 : i32
    return %c0_i32, %c0_i32_0 : i32, i32
  }
  func.func @transform_4(%arg0: i32) -> (i32, i32) {
    %c0_i32 = arith.constant 0 : i32
    %c0_i32_0 = arith.constant 0 : i32
    %c0_i32_1 = arith.constant 0 : i32
    return %c0_i32, %c0_i32_0 : i32, i32
  }
  func.func @transform_5(%arg0: i32) -> (i32, i32) {
    %c0_i32 = arith.constant 0 : i32
    %c0_i32_0 = arith.constant 0 : i32
    %c0_i32_1 = arith.constant 0 : i32
    return %c0_i32, %c0_i32_0 : i32, i32
  }
  func.func @transform_6(%arg0: i32) -> (i32, i32) {
    %c0_i32 = arith.constant 0 : i32
    %c0_i32_0 = arith.constant 0 : i32
    %c0_i32_1 = arith.constant 0 : i32
    return %c0_i32, %c0_i32_0 : i32, i32
  }
  func.func @transform_7(%arg0: i32) -> (i32, i32) {
    %c0_i32 = arith.constant 0 : i32
    %c0_i32_0 = arith.constant 0 : i32
    %c0_i32_1 = arith.constant 0 : i32
    return %c0_i32, %c0_i32_0 : i32, i32
  }
  func.func @transform_8(%arg0: i32) -> (i32, i32) {
    %c0_i32 = arith.constant 0 : i32
    %c0_i32_0 = arith.constant 0 : i32
    %c0_i32_1 = arith.constant 0 : i32
    return %c0_i32, %c0_i32_0 : i32, i32
  }
  func.func @transform_9(%arg0: i32) -> (i32, i32) {
    %c0_i32 = arith.constant 0 : i32
    %c0_i32_0 = arith.constant 0 : i32
    return %c0_i32, %arg0 : i32, i32
  }
}

</mosaic_0001>

<bundles_post_ra>
// kernel: tpu_custom_call.1
= control target key start
LH: loop header
LB: loop body
LE: loop exit
PB: predicated region body
PF: predicated region fallthrough
CT: control target
= control target key end

     0   :  { %14 = vsyncpa [#allocation3], 0  ;;  %s2897_s0 = inlined_call_operand.hbm [shape: f32[8,8,256], index: 0, kind: input, shape index: {}]   ;;  %s2898_s1 = inlined_call_operand.vmem [shape: f32[8,8], index: 1, kind: input, shape index: {}]   ;;  %s2899_s2 = inlined_call_operand.vmem [shape: f32[8,1], index: 2, kind: input, shape index: {}]   ;;  %s2900_s3 = inlined_call_operand.vmem [shape: f32[8,9], index: 3, kind: input, shape index: {}]   ;;  %s2901_s4 = inlined_call_operand.vmem [shape: f32[24,8], index: 4, kind: input, shape index: {}]   ;;  %s2902_s5 = inlined_call_operand.vmem [shape: f32[24,1], index: 5, kind: input, shape index: {}]   ;;  %s2903_s6 = inlined_call_operand.vmem [shape: f32[9,512], index: 6, kind: input, shape index: {}]   ;;  %s2904_s7 = inlined_call_operand.hbm [shape: f32[512,128], index: 7, kind: input, shape index: {}]   ;;  %s2905_s8 = inlined_call_operand.hbm [shape: f32[512,128], index: 8, kind: input, shape index: {}]   ;;  %s2906_s9 = inlined_call_operand.hbm [shape: f32[32,512], index: 9, kind: output, shape index: {}]  }
   0x1   :  { %16 = vsyncpa [#allocation3 + $0x1], 0 }
   0x2   :  { %17 = vsyncpa [#allocation6], 0 }
   0x3   :  { %18 = vsyncpa [#allocation4], 0 }
   0x4   :  { %20 = vsyncpa [#allocation4 + $0x1], 0  ;;  %s2214_s30 = smov 0   ;;  %s2216_s10 = smov 0  }
   0x5   :  { %s2218_s11 = smov 0   ;;  %s2220_s12 = smov 0  }
   0x6 LB: > { %s2235_s13 = sadd.s32 4294967295, %s2132_s12   ;;  %s1555_s14 = sadd.s32 4294967294, %s2132_s12   ;;  %s2132_s12 = sphi %s2220_s12, %s2950_s12   ;;  %s2128_s11 = sphi %s2218_s11, %s2949_s11   ;;  %s2124_s10 = sphi %s2216_s10, %s2948_s10   ;;  %s2120_s30 = sphi %s2214_s30, %s2947_s30  }
   0x7   : > { %p46_p0 = scmp.ne.s32.totalorder %s2124_s10, %s2120_s30  ;;  %p2907_p1 = scmp.eq.s32.totalorder %s2235_s13, 0 }
   0x8   : > { %p244_p3 = scmp.eq.s32.totalorder %s1555_s14, 3  ;;  %p1556_p5 = scmp.ge.s32.totalorder %s2132_s12, 1 }
   0x9   : > { %p2244_p4 = por %p2907_p1, %p46_p0  ;;  %p251_p7 = scmp.lt.s32.totalorder %s2132_s12, 5 }
   0xa   : > { %p2249_p6 = por %p244_p3, %p46_p0  ;;  %s2134_s18 = smov [#allocation5]  }
   0xb   : > { %s2917_s15 = scalar_select %p2244_p4, 1, 0 }
   0xc   : > { %s2918_s16 = scalar_select %p2249_p6, 1, 0 }
   0xd   : > { %p2254_p8 = pnand %p1556_p5, %p251_p7  ;;  %s281_s19 = sshll.u32 %s2134_s18, 4  ;;  %s282_s19 = int_to_ptr.vmem [resolvable:$true] %s281_s19 }
   0xe   : > { %2919 = sst [smem:[#allocation12_spill]] %s2918_s16  ;;  %s2135_s21 = smov [#allocation7]  }
   0xf   : > { %s2920_s17 = scalar_select %p2254_p8, 1, 0 }
  0x10   : > { %p1881_p9 = pneg %p2254_p8  ;;  %s294_s22 = sshll.u32 %s2135_s21, 4  ;;  %s2266_s22 = int_to_ptr.vmem [resolvable:$true] %s294_s22 }
  0x11   : > { %s1976_s25 = scalar_lea.hbm %s2904_s7, 8192 }
  0x12   : > { %p2262_p10 = pnand %p1881_p9, %p2907_p1  ;;  %p1977_p11 = scmp.ne.s32.totalorder %s2904_s7, %s1976_s25 }
  0x13   : > { %p1983_p3 = scmp.lt.u32.totalorder %s1976_s25, %s2904_s7 }
  0x14   : > { %p1978_p12 = pneg %p2262_p10 }
  0x16   : > { %p1979_p13 = pnand %p1978_p12, %p1977_p11 }
  0x18   : > { %p1980_p0 = pneg %p1979_p13 }
  0x1a   : > { %p1985_p5 = pnand %p1983_p3, %p1980_p0 }
  0x1c   : > { %1988 = shalt.err (!%p1985_p5)
}
  0x1d   : > { %s1989_s14 = scalar_lea.vmem %s282_s19, 8192  ;;  %p1997_p2 = scmp.lt.s32.totalorder %s282_s19, %s282_s19 }
  0x1e   : > { %p1990_p7 = scmp.ne.s32.totalorder %s282_s19, %s1989_s14  ;;  %p1998_p6 = scmp.lt.s32.totalorder %s1989_s14, %s1989_s14 }
  0x20   : > { %p1992_p9 = pnand %p1990_p7, %p1978_p12  ;;  %p1999_p4 = por %p1998_p6, %p1997_p2 }
  0x22   : > { %p1993_p1 = pneg %p1992_p9 }
  0x24   : > { %p2000_p8 = pnand %p1999_p4, %p1993_p1 }
  0x26   : > { %2003 = shalt.err (!%p2000_p8)
}
  0x27   : > { %s2136_s18 = smov 128   ;;  %s2137_s21 = smov 8  }
  0x28   : > { %1884 = dma.hbm_to_vmem [thread:$0]  (!%p2262_p10), %s2904_s7, 8192, %s282_s19, [#allocation6], %s2136_s18, %s2136_s18, %s2137_s21  }
  0x29   : > { %s2004_s27 = scalar_lea.hbm %s2905_s8, 8192 }
  0x2a   : > { %p2005_p11 = scmp.ne.s32.totalorder %s2905_s8, %s2004_s27  ;;  %p2011_p4 = scmp.lt.u32.totalorder %s2004_s27, %s2905_s8 }
  0x2c   : > { %p2007_p1 = pnand %p2005_p11, %p1978_p12 }
  0x2e   : > { %p2008_p2 = pneg %p2007_p1 }
  0x30   : > { %p2013_p6 = pnand %p2011_p4, %p2008_p2 }
  0x32   : > { %2016 = shalt.err (!%p2013_p6)
}
  0x33   : > { %s2017_s19 = scalar_lea.vmem %s2266_s22, 8192  ;;  %p2025_p3 = scmp.lt.s32.totalorder %s2266_s22, %s2266_s22 }
  0x34   : > { %p2018_p8 = scmp.ne.s32.totalorder %s2266_s22, %s2017_s19  ;;  %p2026_p5 = scmp.lt.s32.totalorder %s2017_s19, %s2017_s19 }
  0x36   : > { %p2020_p13 = pnand %p2018_p8, %p1978_p12  ;;  %p2027_p7 = por %p2026_p5, %p2025_p3 }
  0x38   : > { %p2021_p0 = pneg %p2020_p13 }
  0x3a   : > { %p2028_p9 = pnand %p2027_p7, %p2021_p0 }
  0x3c   : > { %2031 = shalt.err (!%p2028_p9)
}
  0x3d   : > { %1887 = dma.hbm_to_vmem [thread:$0]  (!%p2262_p10), %s2905_s8, 8192, %s2266_s22, [#allocation6], %s2136_s18, %s2136_s18, %s2137_s21  }
  0x3e   : > { %s2316_s24 = sadd.s32 1, %s2132_s12   ;;  %s33_s20 = sadd.s32 1, %s2128_s11 }
  0x3f   : > { %s30_s25 = ssub.s32 %s2132_s12, %s2316_s24  ;;  %p40_p12 = scmp.ne.s32.totalorder %s2128_s11, %s2124_s10 }
  0x40   : > { %p31_p11 = scmp.eq.s32.totalorder %s30_s25, 0  ;;  %p41_p1 = scmp.eq.s32.totalorder %s2132_s12, 0 }
  0x41   : > { %p2922_p2 = scmp.eq.s32.totalorder %s2235_s13, 3  ;;  %p1898_p6 = scmp.lt.s32.totalorder %s2132_s12, 4 }
  0x42   : > { %s2332_s27 = scalar_select %p31_p11, %s2128_s11, %s33_s20  }
  0x43   : > { %p2326_p4 = por %p2922_p2, %p40_p12  ;;  %p42_p8 = por %p41_p1, %p40_p12 }
  0x44   : > { %s308_s28 = sand.u32 1, %s2128_s11   ;;  %s1585_s22 = sshll.u32 %s2132_s12, 9 }
  0x45   : > { %s1560_s29 = sshll.u32 %s308_s28, 5  ;;  %s2339_s14 = scalar_lea.hbm %s2897_s0, %s1585_s22 }
  0x46   : > { %s312_s19 = scalar_lea.vmem [#allocation2], %s1560_s29  ;;  %p2343_p10 = pnand %p1898_p6, %p42_p8 }
  0x47   : > { %s320_s16 = sshll.u32 %s312_s19, 4  ;;  %s2347_s20 = scalar_lea.sflag [#allocation3], %s308_s28  ;;  %s2341_s16 = int_to_ptr.vmem [resolvable:$true] %s320_s16 }
  0x48   : > { %s2032_s25 = scalar_lea.hbm %s2339_s14, 512  ;;  %p2034_p0 = pneg %p2343_p10 }
  0x49   : > { %p2033_p13 = scmp.ne.s32.totalorder %s2339_s14, %s2032_s25  ;;  %s2037_s18 = scalar_lea.hbm %s2897_s0, 2048 }
  0x4a   : > { %p2038_p7 = scmp.lt.u32.totalorder %s2339_s14, %s2897_s0  ;;  %p2039_p9 = scmp.lt.u32.totalorder %s2037_s18, %s2032_s25 }
  0x4b   : > { %p2035_p3 = pnand %p2034_p0, %p2033_p13  ;;  %p2041_p11 = scmp.lt.u32.totalorder %s2032_s25, %s2339_s14 }
  0x4c   : > { %p2040_p12 = por %p2039_p9, %p2038_p7 }
  0x4d   : > { %p2036_p5 = pneg %p2035_p3 }
  0x4e   : > { %p2042_p1 = por %p2041_p11, %p2040_p12 }
  0x50   : > { %p2043_p2 = pnand %p2042_p1, %p2036_p5 }
  0x52   : > { %2046 = shalt.err (!%p2043_p2)
}
  0x53   : > { %s2047_s28 = scalar_lea.vmem %s2341_s16, 512  ;;  %s2138_s29 = smov [#allocation2]  }
  0x54   : > { %p2048_p6 = scmp.ne.s32.totalorder %s2341_s16, %s2047_s28  ;;  %s2052_s22 = sshll.u32 %s2138_s29, 4  ;;  %s2053_s22 = int_to_ptr.vmem [resolvable:$false] %s2052_s22 }
  0x55   : > { %s2054_s21 = scalar_lea.vmem %s2053_s22, 1024  ;;  %p2055_p3 = scmp.lt.s32.totalorder %s2341_s16, %s2053_s22 }
  0x56   : > { %p2050_p8 = pnand %p2048_p6, %p2034_p0  ;;  %p2056_p7 = scmp.lt.s32.totalorder %s2054_s21, %s2047_s28 }
  0x58   : > { %p2051_p13 = pneg %p2050_p8  ;;  %p2057_p9 = por %p2056_p7, %p2055_p3 }
  0x5a   : > { %p2058_p12 = pnand %p2057_p9, %p2051_p13 }
  0x5c   : > { %2061 = shalt.err (!%p2058_p12)
}
  0x5d   : > { %s2139_s25 = smov 256   ;;  %s2140_s18 = smov 16  }
  0x5e   : > { %1891 = dma.hbm_to_vmem [thread:$0]  (!%p2343_p10), %s2339_s14, 512, %s2341_s16, %s2347_s20, %s2139_s25, %s2139_s25, %s2140_s18  }
  0x5f   : > { %p2925_p0 = scmp.ne.s32.totalorder %s2920_s17, 0 }
  0x61   : > { %332 = sbr.rel (%p2925_p0) target bundleno = 1012 (0x3f4), region = 56 }
  0x68   : > { %s2378_s19 = sand.u32 1, %s2124_s10   ;;  %p2926_p5 = scmp.ne.s32.totalorder %s2917_s15, 0 }
  0x69   : > { %s1565_s28 = sshll.u32 %s2378_s19, 5  ;;  %s335_s29 = scalar_lea.sflag [#allocation3], %s2378_s19 }
  0x6a   : > { %s2384_s22 = scalar_lea.vmem [#allocation2], %s1565_s28 }
  0x6b   : > { %2107 = dma.done.wait (%p2926_p5), %s335_s29, 512  }
  0x6c   : > { %2109 = vsyncadd (%p2926_p5), %s335_s29, 4294966784  ;;  %p2927_p10 = scmp.eq.s32.totalorder %s2235_s13, 0 }
  0x6e   : > { %2111 = dma.done.wait (%p2927_p10), [#allocation6], 16384   ;;  %p2928_p11 = pmov %p2927_p10 }
  0x6f   : > { %v2911_v0 = vmov 0.0   ;;  %v2142_v1 = vmov 0   ;;  %v2143_v2 = vmov 1   ;;  %v2397_v3 = vld [vmem:[%s2384_s22 + $0x8] sm:$0xff]  ;;  %v1570_v4 = vld [vmem:[%s2384_s22 + $0x18] sm:$0xff]  ;;  %v382_v5 = vld [vmem:[%s2384_s22] sm:$0xff] }
  0x70   : > { %2113 = vsyncadd (%p2928_p11), [#allocation6], 4294950912  ;;  %462 = vmatprep.mubr.f32.mxu0 %v2911_v0  ;;  %533 = vmatprep.mubr.f32.mxu1 %v2911_v0  ;;  %2929 = vst [vmem:[#allocation13_spill] sm:$0xff] %v2397_v3  ;;  %vm394_vm0 = vcmask 64512   ;;  %v1569_v6 = vld [vmem:[%s2384_s22 + $0x10] sm:$0xff]  ;;  %v387_v7 = vld [vmem:[%s2898_s1] sm:$0xff] }
  0x71   : > { %1962 = vset.pattern.permute.xlu0 %v2142_v1  ;;  %1963 = vset.pattern.permute.xlu1 %v2143_v2  ;;  %v388_v8 = vld [vmem:[%s2899_s2] sm:$0xff]  ;;  %v2144_v10 = vmov 3   ;;  %v2145_v11 = vmov 2   ;;  %v2146_v12 = vmov 4   ;;  %v2147_v13 = vmov 6   ;;  %s2151_s21 = smov 15  }
  0x72   : > { %398 = vmatprep.subr.mxu0 %v2397_v3  ;;  %469 = vmatprep.subr.mxu1 %v1570_v4  ;;  %v544_v9 = vld [vmem:[%s2900_s3] sm:$0xff]  ;;  %v2148_v14 = vmov 5   ;;  %v2149_v15 = vmov 7   ;;  %v2150_v16 = vmov 8   ;;  %s2152_s25 = smov 17   ;;  %s2153_s18 = smov 1  }
  0x73   : > { %399 = vmatpush1.msra.mxu0 %v382_v5  ;;  %470 = vmatpush1.msra.mxu1 %v1569_v6  ;;  %s2154_s29 = smov 127   ;;  %s2155_s15 = smov 16   ;;  %v940_v33 = vld [vmem:[#allocation5 + $0x80] sm:$0xff]  ;;  %v941_v34 = vld [vmem:[#allocation5 + $0x88] sm:$0xff]  ;;  %v942_v39 = vld [vmem:[#allocation5 + $0x90] sm:$0xff]  ;;  %vm2159_vm9 = vmmov 0  }
  0x74   : > { %1571 = vmatmul.mubr.msk.f32.vlgmr.msra.gmra.mrb[0].mxu0 %vm394_vm0, %v387_v7  ;;  %1572 = vmatmul.mubr.msk.f32.vlgmr.msra.gmra.mrb[0].mxu1 %vm394_vm0, %v387_v7  ;;  %s2156_s17 = smov 112   ;;  %s2157_s14 = smov 113   ;;  %v1741_v35 = vpack.c.bf16 %v941_v34, %v940_v33  ;;  %v924_v36 = vld [vmem:[#allocation5] sm:$0xff]  ;;  %v925_v37 = vld [vmem:[#allocation5 + $0x8] sm:$0xff]  ;;  %v943_v40 = vld [vmem:[#allocation5 + $0x98] sm:$0xff] }
  0x75   : > { %391 = vperm.xlu0 %1962, %v388_v8   ;;  %631 = vperm.xlu1 %1963, %v544_v9   ;;  %v1743_v38 = vpack.c.bf16 %v925_v37, %v924_v36  ;;  %v972_v41 = vld [vmem:[#allocation5 + $0x180] sm:$0xff]  ;;  %v1745_v42 = vpack.c.bf16 %v943_v40, %v942_v39  ;;  %v973_v43 = vld [vmem:[#allocation5 + $0x188] sm:$0xff]  ;;  %v926_v44 = vld [vmem:[#allocation5 + $0x10] sm:$0xff]  ;;  %s2158_s16 = smov 111  }
  0x76   : > { %1742 = vmatprep.subr.bf16.mxu0 %v1741_v35  ;;  %v927_v45 = vld [vmem:[#allocation5 + $0x18] sm:$0xff]  ;;  %v1773_v46 = vpack.c.bf16 %v973_v43, %v972_v41  ;;  %v956_v47 = vld [vmem:[#allocation5 + $0x100] sm:$0xff]  ;;  %v957_v48 = vld [vmem:[#allocation5 + $0x108] sm:$0xff] }
  0x77   : > { %1744 = vmatpush3.bf16.msra.mxu0 %v1743_v38  ;;  %v1747_v49 = vpack.c.bf16 %v927_v45, %v926_v44  ;;  %v1775_v50 = vpack.c.bf16 %v957_v48, %v956_v47  ;;  %v944_v51 = vld [vmem:[#allocation5 + $0xa0] sm:$0xff]  ;;  %v945_v52 = vld [vmem:[#allocation5 + $0xa8] sm:$0xff]  ;;  %v974_v53 = vld [vmem:[#allocation5 + $0x190] sm:$0xff] }
  0x78   : > { %1746 = vmatprep.subr.bf16.mxu0 %v1745_v42  ;;  %1774 = vmatprep.subr.bf16.mxu1 %v1773_v46  ;;  %v1749_v54 = vpack.c.bf16 %v945_v52, %v944_v51  ;;  %v975_v55 = vld [vmem:[#allocation5 + $0x198] sm:$0xff]  ;;  %v928_v56 = vld [vmem:[#allocation5 + $0x20] sm:$0xff]  ;;  %v929_v57 = vld [vmem:[#allocation5 + $0x28] sm:$0xff] }
  0x79   : > { %1965 = vset.pattern.permute.xlu0 %v2144_v10  ;;  %1964 = vset.pattern.permute.xlu1 %v2145_v11  ;;  %v1777_v58 = vpack.c.bf16 %v975_v55, %v974_v53  ;;  %v958_v59 = vld [vmem:[#allocation5 + $0x110] sm:$0xff]  ;;  %v959_v60 = vld [vmem:[#allocation5 + $0x118] sm:$0xff]  ;;  %v1751_v61 = vpack.c.bf16 %v929_v57, %v928_v56  ;;  %v976_v2 = vld [vmem:[#allocation5 + $0x1a0] sm:$0xff] }
  0x7a   : > { %721 = vperm.xlu0 %1965, %v544_v9   ;;  %676 = vperm.xlu1 %1964, %v544_v9   ;;  %v1779_v62 = vpack.c.bf16 %v959_v60, %v958_v59  ;;  %v946_v63 = vld [vmem:[#allocation5 + $0xb0] sm:$0xff]  ;;  %v977_v5 = vld [vmem:[#allocation5 + $0x1a8] sm:$0xff]  ;;  %v931_v7 = vld [vmem:[#allocation5 + $0x38] sm:$0xff] }
  0x7b   : > { %1748 = vmatpush3.bf16.msra.mxu0 %v1747_v49  ;;  %1776 = vmatpush3.bf16.msra.mxu1 %v1775_v50  ;;  %v930_v6 = vld [vmem:[#allocation5 + $0x30] sm:$0xff]  ;;  %v1781_v8 = vpack.c.bf16 %v977_v5, %v976_v2  ;;  %v961_v10 = vld [vmem:[#allocation5 + $0x128] sm:$0xff]  ;;  %v951_v34 = vld [vmem:[#allocation5 + $0xd8] sm:$0xff] }
  0x7c   : > { %1750 = vmatprep.subr.bf16.mxu0 %v1749_v54  ;;  %1778 = vmatprep.subr.bf16.mxu1 %v1777_v58  ;;  %v1755_v11 = vpack.c.bf16 %v931_v7, %v930_v6  ;;  %v950_v33 = vld [vmem:[#allocation5 + $0xd0] sm:$0xff]  ;;  %v980_v35 = vld [vmem:[#allocation5 + $0x1c0] sm:$0xff]  ;;  %v981_v37 = vld [vmem:[#allocation5 + $0x1c8] sm:$0xff] }
  0x7d   : > { %v1761_v36 = vpack.c.bf16 %v951_v34, %v950_v33  ;;  %v934_v38 = vld [vmem:[#allocation5 + $0x50] sm:$0xff]  ;;  %v1789_v39 = vpack.c.bf16 %v981_v37, %v980_v35  ;;  %v964_v40 = vld [vmem:[#allocation5 + $0x140] sm:$0xff]  ;;  %v965_v41 = vld [vmem:[#allocation5 + $0x148] sm:$0xff]  ;;  %v561_v37 = vlaneseq }
  0x7e   : > { %1966 = vset.pattern.permute.xlu0 %v2146_v12  ;;  %1968 = vset.pattern.permute.xlu1 %v2147_v13  ;;  %v948_v13 = vld [vmem:[#allocation5 + $0xc0] sm:$0xff]  ;;  %v1791_v43 = vpack.c.bf16 %v965_v41, %v964_v40  ;;  %v953_v45 = vld [vmem:[#allocation5 + $0xe8] sm:$0xff]  ;;  %v982_v46 = vld [vmem:[#allocation5 + $0x1d0] sm:$0xff] }
  0x7f   : > { %733 = vperm.xlu0 %1966, %v544_v9   ;;  %823 = vperm.xlu1 %1968, %v544_v9   ;;  %v952_v44 = vld [vmem:[#allocation5 + $0xe0] sm:$0xff]  ;;  %v983_v48 = vld [vmem:[#allocation5 + $0x1d8] sm:$0xff]  ;;  %v937_v50 = vld [vmem:[#allocation5 + $0x68] sm:$0xff]  ;;  %v2528_v41 = vand.u32 127, %v561_v37 }
  0x80   : > { %1752 = vmatpush3.bf16.msra.mxu0 %v1751_v61  ;;  %1780 = vmatpush3.bf16.msra.mxu1 %v1779_v62  ;;  %v1765_v47 = vpack.c.bf16 %v953_v45, %v952_v44  ;;  %v936_v49 = vld [vmem:[#allocation5 + $0x60] sm:$0xff]  ;;  %v1793_v51 = vpack.c.bf16 %v983_v48, %v982_v46  ;;  %v966_v53 = vld [vmem:[#allocation5 + $0x150] sm:$0xff]  ;;  %v967_v54 = vld [vmem:[#allocation5 + $0x158] sm:$0xff] }
  0x81   : > { %1782 = vmatprep.subr.bf16.mxu1 %v1781_v8  ;;  %v1767_v52 = vpack.c.bf16 %v937_v50, %v936_v49  ;;  %v1795_v55 = vpack.c.bf16 %v967_v54, %v966_v53  ;;  %v954_v56 = vld [vmem:[#allocation5 + $0xf0] sm:$0xff]  ;;  %v955_v57 = vld [vmem:[#allocation5 + $0xf8] sm:$0xff]  ;;  %v984_v58 = vld [vmem:[#allocation5 + $0x1e0] sm:$0xff]  ;;  %vm605_vm1 = vcmp.lt.s32.totalorder %v2528_v41, 16  ;;  %vm563_vm2 = vcmp.lt.s32.totalorder %v2528_v41, 17 }
  0x82   : > { %v1769_v59 = vpack.c.bf16 %v955_v57, %v954_v56  ;;  %v985_v60 = vld [vmem:[#allocation5 + $0x1e8] sm:$0xff]  ;;  %v938_v61 = vld [vmem:[#allocation5 + $0x70] sm:$0xff]  ;;  %v939_v62 = vld [vmem:[#allocation5 + $0x78] sm:$0xff]  ;;  %vm650_vm3 = vcmp.lt.s32.totalorder %v2528_v41, 15  ;;  %vm695_vm4 = vcmp.lt.s32.totalorder %v2528_v41, 1  ;;  %vm752_vm5 = vcmp.lt.s32.totalorder %v2528_v41, 127 }
  0x83   : > { %1967 = vset.pattern.permute.xlu0 %v2148_v14  ;;  %1969 = vset.pattern.permute.xlu1 %v2149_v15  ;;  %v949_v14 = vld [vmem:[#allocation5 + $0xc8] sm:$0xff]  ;;  %v978_v15 = vld [vmem:[#allocation5 + $0x1b0] sm:$0xff]  ;;  %v968_v2 = vld [vmem:[#allocation5 + $0x160] sm:$0xff]  ;;  %vm797_vm6 = vcmp.lt.s32.totalorder %v2528_v41, 113  ;;  %vm842_vm7 = vcmp.lt.s32.totalorder %v2528_v41, 112  ;;  %vm887_vm8 = vcmp.lt.s32.totalorder %v2528_v41, 111 }
  0x84   : > { %778 = vperm.xlu0 %1967, %v544_v9   ;;  %868 = vperm.xlu1 %1969, %v544_v9   ;;  %v986_v6 = vld [vmem:[#allocation5 + $0x1f0] sm:$0xff]  ;;  %v987_v7 = vld [vmem:[#allocation5 + $0x1f8] sm:$0xff]  ;;  %v2541_v45 = vld [vmem:[%s2903_s6 + $0x8] sm:$0xff] }
  0x85   : > { %v1801_v8 = vpack.c.bf16 %v987_v7, %v986_v6  ;;  %v2553_v48 = vld [vmem:[%s2903_s6] sm:$0xff]  ;;  %v2558_v49 = vld [vmem:[%s2903_s6 + $0x18] sm:$0xff] }
  0x86   : > { %v1254_v41 = vld [vmem:[#allocation7 + $0x80] sm:$0xff] }
  0x88   : > { %1970 = vset.pattern.permute.xlu0 %v2150_v16  ;;  %1972 = vset.pattern.permute.xlu1 %v2142_v1  ;;  %v1757_v16 = vpack.c.bf16 %v949_v14, %v948_v13 }
  0x89   : > { %913 = vperm.xlu0 %1970, %v544_v9  }
  0x8d   : > { %1971 = vset.pattern.permute.xlu0 %v2142_v1  ;;  %v947_v1 = vld [vmem:[#allocation5 + $0xb8] sm:$0xff] }
  0x8e   : > { %590 = vperm.xlu0 %1971, %v544_v9   ;;  %v1753_v4 = vpack.c.bf16 %v947_v1, %v946_v63  ;;  %v960_v9 = vld [vmem:[#allocation5 + $0x120] sm:$0xff]  ;;  %v1797_v63 = vpack.c.bf16 %v985_v60, %v984_v58  ;;  %v1771_v1 = vpack.c.bf16 %v939_v62, %v938_v61 }
  0x8f   : > { %v1783_v12 = vpack.c.bf16 %v961_v10, %v960_v9  ;;  %v970_v9 = vld [vmem:[#allocation5 + $0x170] sm:$0xff]  ;;  %v971_v10 = vld [vmem:[#allocation5 + $0x178] sm:$0xff] }
  0x90   : > { %1754 = vmatprep.subr.bf16.mxu0 %v1753_v4  ;;  %v969_v4 = vld [vmem:[#allocation5 + $0x168] sm:$0xff] }
  0x91   : > { %1756 = vmatpush3.bf16.msra.mxu0 %v1755_v11  ;;  %1784 = vmatpush3.bf16.msra.mxu1 %v1783_v12  ;;  %v1799_v5 = vpack.c.bf16 %v969_v4, %v968_v2  ;;  %v1803_v11 = vpack.c.bf16 %v971_v10, %v970_v9 }
  0x92   : > { %1758 = vmatprep.subr.bf16.mxu0 %v1757_v16 }
  0xf4   : > { %v392_v17 = vpop.permute.xlu0 %391  ;;  %v2490_v12 = vpop.permute.xlu1 %631 }
  0xf9   : > { %v2414_v18 = vpop.permute.xlu0 %721  ;;  %v2492_v13 = vpop.permute.xlu1 %676 }
  0xfe   : > { %v2416_v25 = vpop.permute.xlu0 %733 }
 0x103   : > { %v2494_v14 = vpop.permute.xlu0 %778 }
 0x108   : > { %v2498_v16 = vpop.permute.xlu0 %913 }
 0x109   : > { %2931 = vst [vmem:[#allocation15_spill] sm:$0xff] %v2498_v16 }
 0x147   : > { %v464_v19 = vpop.f32.mrb[0].mxu0  ;;  %v535_v20 = vpop.f32.mrb[0].mxu1 }
 0x148   : > { %v465_v21 = vadd.f32 %v464_v19, %v392_v17  ;;  %v536_v22 = vadd.f32 %v535_v20, %v392_v17  ;;  %v466_v23 = vpop.f32.mrb[1].mxu0  ;;  %v537_v24 = vpop.f32.mrb[1].mxu1  ;;  %v932_v19 = vld [vmem:[#allocation5 + $0x40] sm:$0xff]  ;;  %v933_v20 = vld [vmem:[#allocation5 + $0x48] sm:$0xff] }
 0x149   : > { %v467_v29 = vadd.f32 %v466_v23, %v392_v17  ;;  %v538_v31 = vadd.f32 %v537_v24, %v392_v17  ;;  %v979_v17 = vld [vmem:[#allocation5 + $0x1b8] sm:$0xff]  ;;  %v1131_v24 = vld [vmem:[%s2902_s5] sm:$0xff] }
 0x14a   : > { %v2418_v26 = vmax.f32 %v465_v21, 0.0  ;;  %v2420_v27 = vmax.f32 %v536_v22, 0.0  ;;  %v1785_v21 = vpack.c.bf16 %v979_v17, %v978_v15  ;;  %v962_v22 = vld [vmem:[#allocation5 + $0x130] sm:$0xff]  ;;  %v963_v23 = vld [vmem:[#allocation5 + $0x138] sm:$0xff]  ;;  %v2496_v15 = vpop.permute.xlu1 %823 }
 0x14b   : > { %v2442_v30 = vmax.f32 %v467_v29, 0.0  ;;  %v2447_v32 = vmax.f32 %v538_v31, 0.0  ;;  %v1759_v29 = vpack.c.bf16 %v933_v20, %v932_v19  ;;  %v1787_v31 = vpack.c.bf16 %v963_v23, %v962_v22  ;;  %2930 = vst [vmem:[#allocation14_spill] sm:$0xff] %v2496_v15  ;;  %v2502_v19 = vpop.permute.xlu0 %590 }
 0x14c   : > { %v2424_v28 = vmul.f32 %v2416_v25, %v2420_v27  ;;  %642 = vrot.lane.b32.xlu1 %v2418_v26, %s2151_s21  ;;  %553 = vrot.lane.b32.xlu0 %v2418_v26, %s2152_s25 }
 0x14d   : > { %1786 = vmatprep.subr.bf16.mxu1 %v1785_v21  ;;  %1760 = vmatpush3.bf16.msra.mxu0 %v1759_v29  ;;  %v2574_v53 = vmul.f32 %v2416_v25, %v2447_v32 }
 0x14e   : > { %1788 = vmatpush3.bf16.msra.mxu1 %v1787_v31  ;;  %1762 = vmatprep.subr.bf16.mxu0 %v1761_v36  ;;  %v2500_v17 = vpop.permute.xlu1 %868 }
 0x14f   : > { %1790 = vmatprep.subr.bf16.mxu1 %v1789_v39  ;;  %2932 = vst [vmem:[#allocation16_spill] sm:$0xff] %v2500_v17  ;;  %v2526_v39 = vshrl.u32 %v561_v37, 7  ;;  %2933 = vst [vmem:[#allocation17_spill] sm:$0xff] %v2574_v53 }
 0x150   : > { %687 = vrot.lane.b32.xlu1 %v2418_v26, %s2153_s18  ;;  %557 = vrot.lane.b32.xlu0 %v2420_v27, %s2152_s25 }
 0x151   : > { %v2536_v44 = vsub.s32 1, %v2526_v39  ;;  %v2562_v50 = vsub.s32 2, %v2526_v39  ;;  %v2613_v4 = vsub.s32 3, %v2526_v39 }
 0x152   : > { %1792 = vmatpush3.bf16.msra.mxu1 %v1791_v43 }
 0x153   : > { %1794 = vmatprep.subr.bf16.mxu1 %v1793_v51  ;;  %v2566_v51 = vmul.f32 %v2416_v25, %v2418_v26  ;;  %v613_v61 = vrot.slane %v2553_v48, %v2536_v44  ;;  %v670_v10 = vrot.slane %v2558_v49, %v2562_v50  ;;  %v715_v16 = vrot.slane %v2558_v49, %v2613_v4 }
 0x154   : > { %744 = vrot.lane.b32.xlu1 %v2418_v26, %s2154_s29  ;;  %597 = vrot.lane.b32.xlu0 %v2418_v26, %s2155_s15 }
 0x156   : > { %1796 = vmatpush3.bf16.msra.mxu1 %v1795_v55 }
 0x157   : > { %1798 = vmatprep.subr.bf16.mxu1 %v1797_v63  ;;  %v625_v63 = vrot.slane %v2558_v49, %v2536_v44 }
 0x158   : > { %748 = vrot.lane.b32.xlu1 %v2420_v27, %s2154_s29  ;;  %601 = vrot.lane.b32.xlu0 %v2420_v27, %s2155_s15 }
 0x15a   : > { %1800 = vmatpush3.bf16.msra.mxu1 %v1799_v5 }
 0x15b   : > { %1802 = vmatprep.subr.bf16.mxu1 %v1801_v8  ;;  %v658_v8 = vrot.slane %v2553_v48, %v2562_v50 }
 0x15c   : > { %834 = vrot.lane.b32.xlu1 %v2418_v26, %s2156_s17  ;;  %646 = vrot.lane.b32.xlu0 %v2420_v27, %s2151_s21 }
 0x15e   : > { %1804 = vmatpush3.bf16.msra.mxu1 %v1803_v11 }
 0x160   : > { %555 = vrot.lane.b32.xlu1 %v2442_v30, %s2152_s25  ;;  %691 = vrot.lane.b32.xlu0 %v2420_v27, %s2153_s18 }
 0x164   : > { %559 = vrot.lane.b32.xlu1 %v2447_v32, %s2152_s25  ;;  %789 = vrot.lane.b32.xlu0 %v2418_v26, %s2157_s14 }
 0x168   : > { %599 = vrot.lane.b32.xlu1 %v2442_v30, %s2155_s15  ;;  %793 = vrot.lane.b32.xlu0 %v2420_v27, %s2157_s14 }
 0x16c   : > { %603 = vrot.lane.b32.xlu1 %v2447_v32, %s2155_s15  ;;  %838 = vrot.lane.b32.xlu0 %v2420_v27, %s2156_s17 }
 0x170   : > { %644 = vrot.lane.b32.xlu1 %v2442_v30, %s2151_s21  ;;  %746 = vrot.lane.b32.xlu0 %v2442_v30, %s2154_s29 }
 0x174   : > { %648 = vrot.lane.b32.xlu1 %v2447_v32, %s2151_s21  ;;  %750 = vrot.lane.b32.xlu0 %v2447_v32, %s2154_s29  ;;  %s1451_s21 = scalar_lea.sflag [#allocation4], %s2378_s19 }
 0x178   : > { %689 = vrot.lane.b32.xlu1 %v2442_v30, %s2153_s18  ;;  %879 = vrot.lane.b32.xlu0 %v2418_v26, %s2158_s16  ;;  %v2583_v26 = vsub.s32 5, %v2526_v39 }
 0x17c   : > { %693 = vrot.lane.b32.xlu1 %v2447_v32, %s2153_s18  ;;  %883 = vrot.lane.b32.xlu0 %v2420_v27, %s2158_s16  ;;  %v935_v27 = vld [vmem:[#allocation5 + $0x58] sm:$0xff] }
 0x17d   : > { %v1763_v42 = vpack.c.bf16 %v935_v27, %v934_v38 }
 0x17f   : > { %1764 = vmatpush3.bf16.msra.mxu0 %v1763_v42  ;;  %v2531_v42 = vsub.s32 0, %v2526_v39 }
 0x180   : > { %791 = vrot.lane.b32.xlu1 %v2442_v30, %s2157_s14  ;;  %1136 = vperm.xlu0 %1971, %v1131_v24  }
 0x181   : > { %1766 = vmatprep.subr.bf16.mxu0 %v1765_v47  ;;  %v2548_v47 = vld [vmem:[%s2903_s6 + $0x10] sm:$0xff]  ;;  %v575_v54 = vrot.slane %v2541_v45, %v2531_v42 }
 0x182   : > { %v621_v55 = vrot.slane %v2548_v47, %v2536_v44  ;;  %v666_v62 = vrot.slane %v2548_v47, %v2562_v50 }
 0x183   : > { %1768 = vmatpush3.bf16.msra.mxu0 %v1767_v52  ;;  %v2570_v52 = vmul.f32 %v2416_v25, %v2442_v30  ;;  %v571_v25 = vrot.slane %v2553_v48, %v2531_v42 }
 0x184   : > { %795 = vrot.lane.b32.xlu1 %v2447_v32, %s2157_s14  ;;  %1770 = vmatprep.subr.bf16.mxu0 %v1769_v59  ;;  %v617_v59 = vrot.slane %v2541_v45, %v2536_v44  ;;  %v2643_v44 = vsub.s32 6, %v2526_v39  ;;  %s380_s14 = scalar_lea.vmem [#allocation8], %s1565_s28 }
 0x187   : > { %1772 = vmatpush3.bf16.msra.mxu0 %v1771_v1  ;;  %v662_v1 = vrot.slane %v2541_v45, %v2562_v50 }
 0x188   : > { %836 = vrot.lane.b32.xlu1 %v2442_v30, %s2156_s17  ;;  %1730 = vmatprep.subr.mxu0 %v2911_v0  ;;  %v711_v0 = vrot.slane %v2548_v47, %v2613_v4 }
 0x18c   : > { %840 = vrot.lane.b32.xlu1 %v2447_v32, %s2156_s17 }
 0x190   : > { %881 = vrot.lane.b32.xlu1 %v2442_v30, %s2158_s16  ;;  %v579_v30 = vrot.slane %v2548_v47, %v2531_v42 }
 0x194   : > { %885 = vrot.lane.b32.xlu1 %v2447_v32, %s2158_s16  ;;  %s1581_s16 = sshll.u32 %s2235_s13, 7  ;;  %s2160_s13 = smov [#allocation8]  }
 0x195   : > { %s2854_s20 = scalar_lea.hbm %s2906_s9, %s1581_s16  ;;  %s2066_s18 = sshll.u32 %s2160_s13, 4  ;;  %s2067_s18 = int_to_ptr.vmem [resolvable:$false] %s2066_s18 }
 0x196   : > { %s2068_s29 = scalar_lea.vmem %s2067_s18, 1024 }
 0x1be   : > { %v2504_v20 = vpop.permute.xlu1 %642  ;;  %v2506_v21 = vpop.permute.xlu0 %553 }
 0x1c2   : > { %v2508_v22 = vpop.permute.xlu1 %687  ;;  %v2510_v23 = vpop.permute.xlu0 %557 }
 0x1c6   : > { %v2512_v24 = vpop.permute.xlu1 %744  ;;  %v598_v29 = vpop.permute.xlu0 %597 }
 0x1ca   : > { %v2514_v31 = vpop.permute.xlu1 %748  ;;  %v2516_v33 = vpop.permute.xlu0 %601 }
 0x1ce   : > { %v2518_v34 = vpop.permute.xlu1 %834  ;;  %v2520_v35 = vpop.permute.xlu0 %646 }
 0x1d2   : > { %v556_v36 = vpop.permute.xlu1 %555  ;;  %v2524_v27 = vpop.permute.xlu0 %691 }
 0x1d3   : > { %v565_v58 = vsel %vm563_vm2, %v556_v36, %v2510_v23 }
 0x1d4   : > { %v586_v9 = vmul.f32 %v579_v30, %v565_v58  ;;  %v707_v58 = vrot.slane %v2541_v45, %v2613_v4 }
 0x1d6   : > { %v2522_v38 = vpop.permute.xlu1 %559  ;;  %v2533_v43 = vpop.permute.xlu0 %789  ;;  %v595_v7 = vmul.f32 %v2502_v19, %v586_v9 }
 0x1da   : > { %v600_v40 = vpop.permute.xlu1 %599  ;;  %v2599_v60 = vpop.permute.xlu0 %793 }
 0x1db   : > { %v607_v56 = vsel %vm605_vm1, %v600_v40, %v2516_v33  ;;  %v608_v50 = vsel %vm605_vm1, %v598_v29, %v600_v40  ;;  %v703_v40 = vrot.slane %v2553_v48, %v2613_v4 }
 0x1dc   : > { %v628_v5 = vmul.f32 %v621_v55, %v607_v56  ;;  %v567_v55 = vsel %vm563_vm2, %v2522_v38, %v2506_v21 }
 0x1dd   : > { %v584_v6 = vmul.f32 %v571_v25, %v567_v55  ;;  %v805_v25 = vrot.slane %v2553_v48, %v2643_v44 }
 0x1de   : > { %v2543_v46 = vpop.permute.xlu1 %603  ;;  %v2649_v37 = vpop.permute.xlu0 %838 }
 0x1df   : > { %v609_v56 = vsel %vm605_vm1, %v2543_v46, %v598_v29  ;;  %v593_v4 = vmul.f32 %v2502_v19, %v584_v6 }
 0x1e0   : > { %v626_v32 = vmul.f32 %v613_v61, %v609_v56 }
 0x1e2   : > { %v645_v57 = vpop.permute.xlu1 %644  ;;  %v634_v9 = vmul.f32 %v2490_v12, %v626_v32 }
 0x1e3   : > { %v652_v2 = vsel %vm650_vm3, %v645_v57, %v2520_v35 }
 0x1e4   : > { %v673_v30 = vmul.f32 %v666_v62, %v652_v2  ;;  %v566_v62 = vsel %vm563_vm2, %v2506_v21, %v556_v36  ;;  %v636_v2 = vmul.f32 %v2490_v12, %v628_v5  ;;  %v627_v21 = vmul.f32 %v617_v59, %v608_v50 }
 0x1e5   : > { %v653_v36 = vsel %vm650_vm3, %v2504_v20, %v645_v57  ;;  %v585_v53 = vmul.f32 %v575_v54, %v566_v62  ;;  %v809_v59 = vrot.slane %v2541_v45, %v2643_v44  ;;  %v2695_v50 = vsub.s32 7, %v2526_v39 }
 0x1e6   : > { %v649_v11 = vpop.permute.xlu1 %648  ;;  %v681_v5 = vmul.f32 %v2492_v13, %v673_v30  ;;  %v640_v57 = vadd.f32 %v636_v2, %v595_v7  ;;  %v672_v55 = vmul.f32 %v662_v1, %v653_v36  ;;  %v635_v30 = vmul.f32 %v2490_v12, %v627_v21 }
 0x1e7   : > { %v654_v29 = vsel %vm650_vm3, %v649_v11, %v2504_v20  ;;  %v564_v20 = vsel %vm563_vm2, %v2510_v23, %v2522_v38  ;;  %v747_v38 = vpop.permute.xlu0 %746  ;;  %v594_v32 = vmul.f32 %v2502_v19, %v585_v53  ;;  %v638_v62 = vadd.f32 %v634_v9, %v593_v4 }
 0x1e8   : > { %v671_v15 = vmul.f32 %v658_v8, %v654_v29  ;;  %v606_v8 = vsel %vm605_vm1, %v2516_v33, %v2543_v46  ;;  %v685_v23 = vadd.f32 %v681_v5, %v640_v57  ;;  %v680_v2 = vmul.f32 %v2492_v13, %v672_v55 }
 0x1e9   : > { %v629_v1 = vmul.f32 %v625_v63, %v606_v8  ;;  %v755_v53 = vsel %vm752_vm5, %v2512_v24, %v747_v38  ;;  %v639_v29 = vadd.f32 %v635_v30, %v594_v32  ;;  %v2935_v57 = vrot.slane %v2553_v48, %v2583_v26 }
 0x1ea   : > { %v690_v3 = vpop.permute.xlu1 %689  ;;  %v850_v9 = vrot.slane %v2553_v48, %v2695_v50  ;;  %v854_v30 = vrot.slane %v2541_v45, %v2695_v50  ;;  %v2939_v48 = vld [vmem:[#allocation14_spill] sm:$0xff] }
 0x1eb   : > { %v697_v17 = vsel %vm695_vm4, %v690_v3, %v2524_v27  ;;  %v698_v61 = vsel %vm695_vm4, %v2508_v22, %v690_v3  ;;  %v651_v3 = vsel %vm650_vm3, %v2520_v35, %v649_v11  ;;  %v637_v36 = vmul.f32 %v2490_v12, %v629_v1  ;;  %v751_v5 = vpop.permute.xlu0 %750 }
 0x1ec   : > { %v718_v54 = vmul.f32 %v711_v0, %v697_v17  ;;  %v679_v17 = vmul.f32 %v2492_v13, %v671_v15  ;;  %v717_v33 = vmul.f32 %v707_v58, %v698_v61  ;;  %v2934_v15 = vrot.slane %v2558_v49, %v2531_v42 }
 0x1ed   : > { %v674_v39 = vmul.f32 %v670_v10, %v651_v3  ;;  %v684_v10 = vadd.f32 %v680_v2, %v639_v29  ;;  %v773_v61 = vmul.f32 %v2935_v57, %v755_v53  ;;  %v753_v55 = vsel %vm752_vm5, %v2514_v31, %v751_v5 }
 0x1ee   : > { %v694_v56 = vpop.permute.xlu1 %693  ;;  %v726_v7 = vmul.f32 %v2414_v18, %v718_v54  ;;  %v587_v58 = vmul.f32 %v2934_v15, %v564_v20  ;;  %v725_v21 = vmul.f32 %v2414_v18, %v717_v33  ;;  %v817_v20 = vrot.slane %v2558_v49, %v2643_v44 }
 0x1ef   : > { %v699_v0 = vsel %vm695_vm4, %v694_v56, %v2508_v22  ;;  %v696_v22 = vsel %vm695_vm4, %v2524_v27, %v694_v56  ;;  %v813_v27 = vrot.slane %v2548_v47, %v2643_v44  ;;  %v756_v3 = vsel %vm752_vm5, %v751_v5, %v2512_v24  ;;  %v880_v24 = vpop.permute.xlu0 %879 }
 0x1f0   : > { %v716_v46 = vmul.f32 %v703_v40, %v699_v0  ;;  %v730_v6 = vadd.f32 %v726_v7, %v685_v23  ;;  %v683_v40 = vadd.f32 %v679_v17, %v638_v62  ;;  %v719_v42 = vmul.f32 %v715_v16, %v696_v22 }
 0x1f1   : > { %v596_v12 = vmul.f32 %v2502_v19, %v587_v58  ;;  %v682_v16 = vmul.f32 %v2492_v13, %v674_v39  ;;  %v729_v56 = vadd.f32 %v725_v21, %v684_v10  ;;  %v858_v19 = vrot.slane %v2548_v47, %v2695_v50 }
 0x1f2   : > { %v724_v35 = vmul.f32 %v2414_v18, %v716_v46  ;;  %v792_v11 = vpop.permute.xlu1 %791  ;;  %v2709_v63 = vadd.f32 %v2424_v28, %v730_v6  ;;  %v754_v28 = vsel %vm752_vm5, %v747_v38, %v2514_v31  ;;  %v2936_v13 = vrot.slane %v2541_v45, %v2583_v26 }
 0x1f3   : > { %v799_v8 = vsel %vm797_vm6, %v792_v11, %v2599_v60  ;;  %v641_v23 = vadd.f32 %v637_v36, %v596_v12  ;;  %v727_v7 = vmul.f32 %v2414_v18, %v719_v42  ;;  %v800_v0 = vsel %vm797_vm6, %v2533_v43, %v792_v11  ;;  %v2941_v36 = vld [vmem:[#allocation16_spill] sm:$0xff] }
 0x1f4   : > { %v728_v54 = vadd.f32 %v724_v35, %v683_v40  ;;  %v774_v38 = vmul.f32 %v2936_v13, %v754_v28  ;;  %v781_v31 = vmul.f32 %v2494_v14, %v773_v61  ;;  %v819_v33 = vmul.f32 %v809_v59, %v799_v8 }
 0x1f5   : > { %v686_v32 = vadd.f32 %v682_v16, %v641_v23  ;;  %v2937_v45 = vrot.slane %v2548_v47, %v2583_v26  ;;  %v741_v62 = vadd.f32 %v2570_v52, %v729_v56  ;;  %v2938_v2 = vrot.slane %v2558_v49, %v2583_v26  ;;  %v1576_v23 = vld [vmem:[%s2903_s6 + $0x38] ss:$0 sm:$0xff] }
 0x1f6   : > { %v796_v4 = vpop.permute.xlu1 %795  ;;  %v740_v17 = vadd.f32 %v2566_v51, %v728_v54  ;;  %v818_v51 = vmul.f32 %v805_v25, %v800_v0  ;;  %v782_v15 = vmul.f32 %v2494_v14, %v774_v38  ;;  %v827_v44 = vmul.f32 %v2939_v48, %v819_v33  ;;  %v2942_v0 = vld [vmem:[#allocation15_spill] sm:$0xff] }
 0x1f7   : > { %v775_v1 = vmul.f32 %v2937_v45, %v753_v55  ;;  %v798_v47 = vsel %vm797_vm6, %v2599_v60, %v796_v4  ;;  %v801_v59 = vsel %vm797_vm6, %v796_v4, %v2533_v43  ;;  %v776_v22 = vmul.f32 %v2938_v2, %v756_v3 }
 0x1f8   : > { %v731_v35 = vadd.f32 %v727_v7, %v686_v32  ;;  %v785_v58 = vadd.f32 %v781_v31, %v740_v17  ;;  %v862_v25 = vrot.slane %v2558_v49, %v2695_v50  ;;  %v820_v53 = vmul.f32 %v813_v27, %v798_v47  ;;  %v2940_v50 = vld [vmem:[#allocation17_spill] sm:$0xff] }
 0x1f9   : > { %v821_v39 = vmul.f32 %v817_v20, %v801_v59  ;;  %v783_v29 = vmul.f32 %v2494_v14, %v775_v1  ;;  %v786_v40 = vadd.f32 %v782_v15, %v741_v62  ;;  %v826_v21 = vmul.f32 %v2939_v48, %v818_v51  ;;  %v884_v20 = vpop.permute.xlu0 %883  ;;  %v1238_v15 = vld [vmem:[#allocation7] sm:$0xff] }
 0x1fa   : > { %v837_v46 = vpop.permute.xlu1 %836  ;;  %v784_v49 = vmul.f32 %v2494_v14, %v776_v22  ;;  %v743_v27 = vadd.f32 %v2940_v50, %v731_v35  ;;  %v828_v54 = vmul.f32 %v2939_v48, %v820_v53  ;;  %v2943_v35 = vld [vmem:[#allocation13_spill] sm:$0xff]  ;;  %v1240_v53 = vld [vmem:[#allocation7 + $0x10] sm:$0xff] }
 0x1fb   : > { %v844_v18 = vsel %vm842_vm7, %v837_v46, %v2649_v37  ;;  %v845_v6 = vsel %vm842_vm7, %v2518_v34, %v837_v46  ;;  %v830_v10 = vadd.f32 %v826_v21, %v785_v58  ;;  %v831_v28 = vadd.f32 %v827_v44, %v786_v40  ;;  %v1239_v58 = vld [vmem:[#allocation7 + $0x8] sm:$0xff]  ;;  %v1256_v44 = vld [vmem:[#allocation7 + $0x90] sm:$0xff]  ;;  %v1242_v21 = vld [vmem:[#allocation7 + $0x20] sm:$0xff] }
 0x1fc   : > { %v863_v11 = vmul.f32 %v850_v9, %v845_v6  ;;  %v864_v52 = vmul.f32 %v854_v30, %v844_v18  ;;  %v829_v4 = vmul.f32 %v2939_v48, %v821_v39  ;;  %v787_v55 = vadd.f32 %v783_v29, %v2709_v63  ;;  %v1241_v39 = vld [vmem:[#allocation7 + $0x18] sm:$0xff]  ;;  %v1259_v29 = vld [vmem:[#allocation7 + $0xa8] sm:$0xff] }
 0x1fd   : > { %v788_v56 = vadd.f32 %v784_v49, %v743_v27  ;;  %v1807_v48 = vpack.c.bf16 %v1239_v58, %v1238_v15  ;;  %v1243_v49 = vld [vmem:[#allocation7 + $0x28] sm:$0xff]  ;;  %v1260_v27 = vld [vmem:[#allocation7 + $0xb0] sm:$0xff] }
 0x1fe   : > { %v841_v60 = vpop.permute.xlu1 %840  ;;  %v871_v5 = vmul.f32 %v2941_v36, %v863_v11  ;;  %v872_v42 = vmul.f32 %v2941_v36, %v864_v52  ;;  %v832_v17 = vadd.f32 %v828_v54, %v787_v55  ;;  %v2944_v52 = vmov 0.0   ;;  %v1264_v54 = vld [vmem:[#allocation7 + $0xd0] sm:$0xff]  ;;  %v1266_v55 = vld [vmem:[#allocation7 + $0xe0] sm:$0xff] }
 0x1ff   : > { %v843_v43 = vsel %vm842_vm7, %v2649_v37, %v841_v60  ;;  %v846_v26 = vsel %vm842_vm7, %v841_v60, %v2518_v34  ;;  %v1573_v37 = vld [vmem:[%s2903_s6 + $0x20] ss:$0 sm:$0xff]  ;;  %v1574_v34 = vld [vmem:[%s2903_s6 + $0x28] ss:$0 sm:$0xff]  ;;  %v833_v33 = vadd.f32 %v829_v4, %v788_v56  ;;  %v1815_v50 = vpack.c.bf16 %v1243_v49, %v1242_v21  ;;  %v1265_v4 = vld [vmem:[#allocation7 + $0xd8] sm:$0xff] }
 0x200   : > { %v865_v57 = vmul.f32 %v858_v19, %v843_v43  ;;  %v866_v61 = vmul.f32 %v862_v25, %v846_v26  ;;  %v875_v30 = vadd.f32 %v871_v5, %v830_v10  ;;  %v1575_v19 = vld [vmem:[%s2903_s6 + $0x30] ss:$0 sm:$0xff]  ;;  %v876_v13 = vadd.f32 %v872_v42, %v831_v28  ;;  %v1257_v25 = vld [vmem:[#allocation7 + $0x98] sm:$0xff]  ;;  %v1258_v26 = vld [vmem:[#allocation7 + $0xa0] sm:$0xff] }
 0x201   : > { %v1809_v60 = vpack.c.bf16 %v1257_v25, %v1256_v44  ;;  %v1811_v43 = vpack.c.bf16 %v1241_v39, %v1240_v53  ;;  %v1813_v40 = vpack.c.bf16 %v1259_v29, %v1258_v26  ;;  %v1244_v42 = vld [vmem:[#allocation7 + $0x30] sm:$0xff]  ;;  %v1263_v10 = vld [vmem:[#allocation7 + $0xc8] sm:$0xff]  ;;  %v1273_v44 = vld [vmem:[#allocation7 + $0x118] sm:$0xff] }
 0x202   : > { %v882_v14 = vpop.permute.xlu1 %881  ;;  %v873_v38 = vmul.f32 %v2941_v36, %v865_v57  ;;  %v874_v7 = vmul.f32 %v2941_v36, %v866_v61  ;;  %v1261_v36 = vld [vmem:[#allocation7 + $0xb8] sm:$0xff]  ;;  %v1246_v57 = vld [vmem:[#allocation7 + $0x40] sm:$0xff]  ;;  %v1247_v61 = vld [vmem:[#allocation7 + $0x48] sm:$0xff] }
 0x203   : > { %v889_v12 = vsel %vm887_vm8, %v882_v14, %v884_v20  ;;  %v890_v16 = vsel %vm887_vm8, %v880_v24, %v882_v14  ;;  %v1817_v5 = vpack.c.bf16 %v1261_v36, %v1260_v27  ;;  %v1823_v14 = vpack.c.bf16 %v1247_v61, %v1246_v57  ;;  %v1267_v56 = vld [vmem:[#allocation7 + $0xe8] sm:$0xff]  ;;  %v1290_v25 = vld [vmem:[#allocation7 + $0x1a0] sm:$0xff]  ;;  %v1293_v21 = vld [vmem:[#allocation7 + $0x1b8] sm:$0xff] }
 0x204   : > { %v908_v8 = vmul.f32 %v1573_v37, %v890_v16  ;;  %v909_v9 = vmul.f32 %v1574_v34, %v889_v12  ;;  %v877_v62 = vadd.f32 %v873_v38, %v832_v17  ;;  %v878_v59 = vadd.f32 %v874_v7, %v833_v33  ;;  %v1245_v37 = vld [vmem:[#allocation7 + $0x38] sm:$0xff]  ;;  %v1248_v16 = vld [vmem:[#allocation7 + $0x50] sm:$0xff]  ;;  %v1132_v17 = vld [vmem:[%s2902_s5 + $0x8] sm:$0xff] }
 0x205   : > { %v1819_v34 = vpack.c.bf16 %v1245_v37, %v1244_v42  ;;  %v1825_v12 = vpack.c.bf16 %v1265_v4, %v1264_v54  ;;  %v1268_v38 = vld [vmem:[#allocation7 + $0xf0] sm:$0xff]  ;;  %v1269_v7 = vld [vmem:[#allocation7 + $0xf8] sm:$0xff]  ;;  %1141 = vperm.xlu1 %1972, %v1132_v17   ;;  %v1973_v33 = vld [vmem:[%s2384_s22] sm:$0xff] }
 0x206   : > { %v916_v31 = vmul.f32 %v2942_v0, %v908_v8  ;;  %v917_v3 = vmul.f32 %v2942_v0, %v909_v9  ;;  %v886_v63 = vpop.permute.xlu1 %885  ;;  %v1249_v8 = vld [vmem:[#allocation7 + $0x58] sm:$0xff]  ;;  %v1129_v39 = vld [vmem:[%s2901_s4 + $0x8] sm:$0xff]  ;;  %v1274_v26 = vld [vmem:[#allocation7 + $0x120] sm:$0xff] }
 0x207   : > { %v888_v46 = vsel %vm887_vm8, %v884_v20, %v886_v63  ;;  %v891_v32 = vsel %vm887_vm8, %v886_v63, %v880_v24  ;;  %v1255_v24 = vld [vmem:[#allocation7 + $0x88] sm:$0xff]  ;;  %v1262_v20 = vld [vmem:[#allocation7 + $0xc0] sm:$0xff]  ;;  %v1827_v9 = vpack.c.bf16 %v1249_v8, %v1248_v16  ;;  %v1276_v36 = vld [vmem:[#allocation7 + $0x130] sm:$0xff] }
 0x208   : > { %v920_v45 = vadd.f32 %v916_v31, %v875_v30  ;;  %v910_v1 = vmul.f32 %v1575_v19, %v888_v46  ;;  %v911_v18 = vmul.f32 %v1576_v23, %v891_v32  ;;  %v921_v6 = vadd.f32 %v917_v3, %v876_v13  ;;  %v1250_v19 = vld [vmem:[#allocation7 + $0x60] sm:$0xff]  ;;  %v1251_v23 = vld [vmem:[#allocation7 + $0x68] sm:$0xff]  ;;  %v1252_v31 = vld [vmem:[#allocation7 + $0x70] sm:$0xff] }
 0x209   : > { %v1805_v11 = vpack.c.bf16 %v1255_v24, %v1254_v41  ;;  %v1821_v28 = vpack.c.bf16 %v1263_v10, %v1262_v20  ;;  %v1829_v30 = vpack.c.bf16 %v1267_v56, %v1266_v55  ;;  %v1831_v13 = vpack.c.bf16 %v1251_v23, %v1250_v19  ;;  %v1253_v3 = vld [vmem:[#allocation7 + $0x78] sm:$0xff]  ;;  %v1133_v46 = vld [vmem:[%s2902_s5 + $0x10] sm:$0xff]  ;;  %v1275_v29 = vld [vmem:[#allocation7 + $0x128] sm:$0xff] }
 0x20a   : > { %v918_v51 = vmul.f32 %v2942_v0, %v910_v1  ;;  %v919_v47 = vmul.f32 %v2942_v0, %v911_v18  ;;  %1052 = vmatprep.mubr.f32.mxu0 %v921_v6  ;;  %v1833_v0 = vpack.c.bf16 %v1269_v7, %v1268_v38  ;;  %v1835_v63 = vpack.c.bf16 %v1253_v3, %v1252_v31  ;;  %v1286_v6 = vld [vmem:[#allocation7 + $0x180] sm:$0xff]  ;;  %v1295_v37 = vld [vmem:[#allocation7 + $0x1c8] sm:$0xff]  ;;  %v1974_v20 = vld [vmem:[%s2384_s22 + $0x18] sm:$0xff] }
 0x20b   : > { %1053 = vmatmul.mubr.f32.vlgmr.msra.gmra.mrb[2].mxu0 %v920_v45  ;;  %1806 = vmatprep.subr.bf16.mxu1 %v1805_v11  ;;  %v1128_v11 = vld [vmem:[%s2901_s4] sm:$0xff]  ;;  %v1847_v49 = vpack.c.bf16 %v1275_v29, %v1274_v26  ;;  %v1296_v57 = vld [vmem:[#allocation7 + $0x1d0] sm:$0xff]  ;;  %v1297_v61 = vld [vmem:[#allocation7 + $0x1d8] sm:$0xff] }
 0x20c   : > { %v922_v2 = vadd.f32 %v918_v51, %v877_v62  ;;  %v923_v22 = vadd.f32 %v919_v47, %v878_v59  ;;  %1732 = vmatprep.mubr.msk.f32.mxu0 %vm2159_vm9, %v2944_v52  ;;  %1146 = vperm.xlu1 %1972, %v1133_v46   ;;  %v1287_v62 = vld [vmem:[#allocation7 + $0x188] sm:$0xff]  ;;  %v1270_v47 = vld [vmem:[#allocation7 + $0x100] sm:$0xff]  ;;  %v1857_v54 = vpack.c.bf16 %v1297_v61, %v1296_v57  ;;  %v1280_v4 = vld [vmem:[#allocation7 + $0x150] sm:$0xff]  ;;  %v1137_v46 = vpop.permute.xlu0 %1136 }
 0x20d   : > { %v1271_v59 = vld [vmem:[#allocation7 + $0x108] sm:$0xff]  ;;  %v1837_v41 = vpack.c.bf16 %v1287_v62, %v1286_v6  ;;  %v1294_v42 = vld [vmem:[#allocation7 + $0x1c0] sm:$0xff]  ;;  %v1300_v19 = vld [vmem:[#allocation7 + $0x1f0] sm:$0xff] }
 0x20e   : > { %1122 = vmatprep.mubr.f32.mxu1 %v923_v22  ;;  %v1288_v22 = vld [vmem:[#allocation7 + $0x190] sm:$0xff]  ;;  %v1839_v15 = vpack.c.bf16 %v1271_v59, %v1270_v47  ;;  %v1853_v10 = vpack.c.bf16 %v1295_v37, %v1294_v42  ;;  %v1298_v16 = vld [vmem:[#allocation7 + $0x1e0] sm:$0xff]  ;;  %v1299_v8 = vld [vmem:[#allocation7 + $0x1e8] sm:$0xff] }
 0x20f   : > { %1123 = vmatmul.mubr.f32.vlgmr.msra.gmra.mrb[2].mxu1 %v922_v2  ;;  %v1861_v55 = vpack.c.bf16 %v1299_v8, %v1298_v16  ;;  %v1282_v56 = vld [vmem:[#allocation7 + $0x160] sm:$0xff]  ;;  %v1301_v23 = vld [vmem:[#allocation7 + $0x1f8] sm:$0xff]  ;;  %v1284_v7 = vld [vmem:[#allocation7 + $0x170] sm:$0xff] }
 0x210   : > { %1366 = vmatprep.mubr.f32.mxu1 %v2943_v35  ;;  %1808 = vmatpush3.bf16.msra.mxu1 %v1807_v48  ;;  %v1289_v35 = vld [vmem:[#allocation7 + $0x198] sm:$0xff]  ;;  %v1272_v48 = vld [vmem:[#allocation7 + $0x110] sm:$0xff]  ;;  %v1865_v38 = vpack.c.bf16 %v1301_v23, %v1300_v19 }
 0x211   : > { %1810 = vmatprep.subr.bf16.mxu1 %v1809_v60  ;;  %v1841_v58 = vpack.c.bf16 %v1289_v35, %v1288_v22  ;;  %v1291_v60 = vld [vmem:[#allocation7 + $0x1a8] sm:$0xff]  ;;  %v1843_v53 = vpack.c.bf16 %v1273_v44, %v1272_v48  ;;  %v1975_v3 = vld [vmem:[%s2384_s22 + $0x10] sm:$0xff]  ;;  %s1463_s22 = sshll.u32 %s380_s14, 4  ;;  %s2849_s22 = int_to_ptr.vmem [resolvable:$true] %s1463_s22 }
 0x212   : > { %s2062_s25 = scalar_lea.vmem %s2849_s22, 512  ;;  %p2069_p8 = scmp.lt.s32.totalorder %s2849_s22, %s2067_s18 }
 0x213   : > { %p2063_p1 = scmp.ne.s32.totalorder %s2849_s22, %s2062_s25  ;;  %p2070_p13 = scmp.lt.s32.totalorder %s2068_s29, %s2062_s25 }
 0x214   : > { %1812 = vmatpush3.bf16.msra.mxu1 %v1811_v43  ;;  %v1845_v43 = vpack.c.bf16 %v1291_v60, %v1290_v25 }
 0x215   : > { %1814 = vmatprep.subr.bf16.mxu1 %v1813_v40  ;;  %v1292_v40 = vld [vmem:[#allocation7 + $0x1b0] sm:$0xff]  ;;  %p2064_p2 = pnand %p2063_p1, %p2326_p4  ;;  %p2071_p3 = por %p2070_p13, %p2069_p8 }
 0x216   : > { %v1849_v27 = vpack.c.bf16 %v1293_v21, %v1292_v40 }
 0x217   : > { %p2065_p6 = pneg %p2064_p2 }
 0x218   : > { %1816 = vmatpush3.bf16.msra.mxu1 %v1815_v50  ;;  %v1130_v50 = vld [vmem:[%s2901_s4 + $0x10] sm:$0xff] }
 0x219   : > { %1818 = vmatprep.subr.bf16.mxu1 %v1817_v5  ;;  %v1277_v5 = vld [vmem:[#allocation7 + $0x138] sm:$0xff]  ;;  %p2072_p7 = pnand %p2071_p3, %p2065_p6 }
 0x21c   : > { %1820 = vmatpush3.bf16.msra.mxu1 %v1819_v34  ;;  %v1851_v34 = vpack.c.bf16 %v1277_v5, %v1276_v36 }
 0x21d   : > { %1822 = vmatprep.subr.bf16.mxu1 %v1821_v28  ;;  %v1278_v28 = vld [vmem:[#allocation7 + $0x140] sm:$0xff] }
 0x220   : > { %1824 = vmatpush3.bf16.msra.mxu1 %v1823_v14 }
 0x221   : > { %1826 = vmatprep.subr.bf16.mxu1 %v1825_v12  ;;  %v1281_v12 = vld [vmem:[#allocation7 + $0x158] sm:$0xff] }
 0x224   : > { %1828 = vmatpush3.bf16.msra.mxu1 %v1827_v9  ;;  %v1859_v9 = vpack.c.bf16 %v1281_v12, %v1280_v4 }
 0x225   : > { %1830 = vmatprep.subr.bf16.mxu1 %v1829_v30  ;;  %v1283_v30 = vld [vmem:[#allocation7 + $0x168] sm:$0xff] }
 0x228   : > { %1832 = vmatpush3.bf16.msra.mxu1 %v1831_v13  ;;  %v1863_v13 = vpack.c.bf16 %v1283_v30, %v1282_v56 }
 0x229   : > { %1834 = vmatprep.subr.bf16.mxu1 %v1833_v0  ;;  %v1285_v0 = vld [vmem:[#allocation7 + $0x178] sm:$0xff] }
 0x22a   : > { %v1867_v31 = vpack.c.bf16 %v1285_v0, %v1284_v7 }
 0x22c   : > { %1836 = vmatpush3.bf16.msra.mxu1 %v1835_v63 }
 0x22f   : > { %1367 = vmatmul.mubr.f32.vlgmr.msra.gmra.mrb[4].mxu1 %v1973_v33 }
 0x2de   : > { %v1618_v32 = vpop.f32.mrb[2].mxu0 }
 0x2df   : > { %v1619_v45 = vpop.f32.mrb[3].mxu0 }
 0x2e0   : > { %v1620_v1 = vadd.f32 %v1619_v45, %v1618_v32  ;;  %v1142_v45 = vpop.permute.xlu1 %1141 }
 0x2e2   : > { %v1653_v18 = vpop.f32.mrb[2].mxu1 }
 0x2e3   : > { %v1654_v51 = vpop.f32.mrb[3].mxu1 }
 0x2e4   : > { %v1655_v2 = vadd.f32 %v1654_v51, %v1653_v18  ;;  %v1147_v59 = vpop.permute.xlu1 %1146 }
 0x2e6   : > { %v1125_v24 = vadd.f32 %v1655_v2, %v1620_v1 }
 0x2e8   : > { %1731 = vmatpush3.msra.mxu0 %v1125_v24 }
 0x2e9   : > { %1733 = vmatmul.mubr.msk.f32.vlgmr.msra.gmra.mrb[4].mxu0 %vm394_vm0, %v1128_v11  ;;  %1838 = vmatprep.subr.bf16.mxu0 %v1837_v41 }
 0x2ea   : > { %1840 = vmatpush3.bf16.msra.mxu0 %v1839_v15  ;;  %1735 = vmatprep.mubr.msk.f32.mxu0 %vm2159_vm9, %v2944_v52 }
 0x2eb   : > { %1842 = vmatprep.subr.bf16.mxu0 %v1841_v58 }
 0x2ed   : > { %1736 = vmatmul.mubr.msk.f32.gmra.mrb[6].mxu0 %vm394_vm0, %v1129_v39 }
 0x2ee   : > { %1844 = vmatpush3.bf16.msra.mxu0 %v1843_v53  ;;  %1738 = vmatprep.mubr.msk.f32.mxu0 %vm2159_vm9, %v2944_v52  ;;  %v1279_v52 = vld [vmem:[#allocation7 + $0x148] sm:$0xff] }
 0x2ef   : > { %1846 = vmatprep.subr.bf16.mxu0 %v1845_v43  ;;  %v1855_v14 = vpack.c.bf16 %v1279_v52, %v1278_v28 }
 0x2f1   : > { %1739 = vmatmul.mubr.msk.f32.gmra.mrb[8].mxu0 %vm394_vm0, %v1130_v50 }
 0x2f2   : > { %1848 = vmatpush3.bf16.msra.mxu0 %v1847_v49  ;;  %1436 = vmatprep.mubr.f32.mxu0 %v1974_v20 }
 0x2f3   : > { %1850 = vmatprep.subr.bf16.mxu0 %v1849_v27 }
 0x2f6   : > { %1852 = vmatpush3.bf16.msra.mxu0 %v1851_v34 }
 0x2f7   : > { %1854 = vmatprep.subr.bf16.mxu0 %v1853_v10 }
 0x2fa   : > { %1856 = vmatpush3.bf16.msra.mxu0 %v1855_v14 }
 0x2fb   : > { %1858 = vmatprep.subr.bf16.mxu0 %v1857_v54 }
 0x2fe   : > { %1860 = vmatpush3.bf16.msra.mxu0 %v1859_v9 }
 0x2ff   : > { %1862 = vmatprep.subr.bf16.mxu0 %v1861_v55 }
 0x302   : > { %1864 = vmatpush3.bf16.msra.mxu0 %v1863_v13  ;;  %v1692_v63 = vpop.f32.mrb[4].mxu1 }
 0x303   : > { %1866 = vmatprep.subr.bf16.mxu0 %v1865_v38  ;;  %v1693_v17 = vpop.f32.mrb[5].mxu1 }
 0x304   : > { %v1694_v33 = vadd.f32 %v1693_v17, %v1692_v63 }
 0x306   : > { %1868 = vmatpush3.bf16.msra.mxu0 %v1867_v31 }
 0x309   : > { %1437 = vmatmul.mubr.f32.vlgmr.msra.gmra.mrb[10].mxu0 %v1975_v3 }
 0x3bc   : > { %v1224_v32 = vpop.f32.mrb[4].mxu0 }
 0x3bd   : > { %v1225_v1 = vadd.f32 %v1224_v32, %v1137_v46  ;;  %v1734_v18 = vpop.f32.mrb[5].mxu0 }
 0x3bf   : > { %v1444_v6 = vmax.f32 %v1225_v1, 0.0 }
 0x3c0   : > { %v1229_v62 = vpop.f32.mrb[6].mxu0 }
 0x3c1   : > { %1447 = vst [vmem:[%s380_s14 + $0x8] sm:$0xff] %v1444_v6  ;;  %v1230_v51 = vadd.f32 %v1229_v62, %v1142_v45  ;;  %v1737_v47 = vpop.f32.mrb[7].mxu0 }
 0x3c3   : > { %v1445_v2 = vmax.f32 %v1230_v51, 0.0 }
 0x3c4   : > { %v1234_v22 = vpop.f32.mrb[8].mxu0 }
 0x3c5   : > { %1448 = vst [vmem:[%s380_s14 + $0x10] sm:$0xff] %v1445_v2  ;;  %v1235_v35 = vadd.f32 %v1234_v22, %v1147_v59  ;;  %v1740_v41 = vpop.f32.mrb[9].mxu0 }
 0x3c7   : > { %v1446_v24 = vmax.f32 %v1235_v35, 0.0 }
 0x3c9   : > { %1449 = vst [vmem:[%s380_s14 + $0x18] sm:$0xff] %v1446_v24 }
 0x3dc   : > { %v1727_v11 = vpop.f32.mrb[10].mxu0 }
 0x3dd   : > { %v1728_v15 = vpop.f32.mrb[11].mxu0 }
 0x3de   : > { %v1729_v58 = vadd.f32 %v1728_v15, %v1727_v11 }
 0x3e0   : > { %v1439_v48 = vadd.f32 %v1729_v58, %v1694_v33 }
 0x3e2   : > { %v1442_v44 = vmax.f32 %v1439_v48, 0.0 }
 0x3e4   : > { %1443 = vst [vmem:[%s380_s14] sm:$0xff] %v1442_v44 }
 0x3e5   : > { %2075 = shalt.err (!%p2072_p7)
}
 0x3e6   : > { %s2076_s15 = scalar_lea.hbm %s2854_s20, 512  ;;  %s2080_s16 = scalar_lea.hbm %s2906_s9, 2048 }
 0x3e7   : > { %p2077_p9 = scmp.ne.s32.totalorder %s2854_s20, %s2076_s15  ;;  %p2081_p5 = scmp.lt.u32.totalorder %s2854_s20, %s2906_s9 }
 0x3e8   : > { %p2082_p10 = scmp.lt.u32.totalorder %s2080_s16, %s2076_s15  ;;  %p2084_p1 = scmp.lt.u32.totalorder %s2076_s15, %s2854_s20 }
 0x3e9   : > { %p2078_p12 = pnand %p2077_p9, %p2326_p4 }
 0x3ea   : > { %p2083_p11 = por %p2082_p10, %p2081_p5 }
 0x3eb   : > { %p2079_p0 = pneg %p2078_p12 }
 0x3ec   : > { %p2085_p2 = por %p2084_p1, %p2083_p11 }
 0x3ee   : > { %p2086_p6 = pnand %p2085_p2, %p2079_p0 }
 0x3f0   : > { %2089 = shalt.err (!%p2086_p6)
}
 0x3f1   : > { %s2161_s25 = smov 128   ;;  %s2162_s13 = smov 512  }
 0x3f2   : > { %s2163_s18 = smov 8  }
 0x3f3   : > { %1879 = dma.vmem_to_hbm [thread:$0]  (%p2326_p4), %s2849_s22, 512, %s2854_s20, %s1451_s21, %s2161_s25, %s2162_s13, %s2163_s18  }
 0x3f4 PF: > { %s2945_s29 = sld [smem:[#allocation12_spill]]  ;;  %p1901_p8 = scmp.ge.s32.totalorder %s2132_s12, 2 }
 0x3f5   : > { %s1478_s17 = sand.u32 1, %s2120_s30  }
 0x3f6   : > { %s1479_s15 = scalar_lea.sflag [#allocation4], %s1478_s17 }
 0x3fa   : > { %p2946_p13 = scmp.ne.s32.totalorder %s2945_s29, 0 }
 0x3fc   : > { %p1893_p3 = pnand %p1901_p8, %p2946_p13 }
 0x3fe   : > { %2115 = dma.done.wait (!%p1893_p3), %s1479_s15, 512  }
 0x3ff   : > { %2117 = vsyncadd (!%p1893_p3), %s1479_s15, 4294966784  ;;  %p23_p7 = scmp.ge.s32.totalorder %s2316_s24, 6   ;;  %s2947_s30 = smov %s2124_s10 }
 0x400   : > { %s2948_s10 = smov %s2128_s11  ;;  %s2949_s11 = smov %s2332_s27 }
 0x401   : > { %s2950_s12 = smov %s2316_s24  ;;  %25 = sbr.rel (!%p23_p7) target bundleno = 6 (0x6), region = 110 }
 0x408   :  { %1484 = vsyncpa [#allocation3], 1 }
 0x409   :  { %1486 = vsyncpa [#allocation3 + $0x1], 1 }
 0x40a   :  { %1487 = vsyncpa [#allocation6], 1 }
 0x40b   :  { %1488 = vsyncpa [#allocation4], 1 }
 0x40c   :  { %1490 = vsyncpa [#allocation4 + $0x1], 1 }

</bundles_post_ra>
